<compile_context>
chip_gen: v5e
topology: v5e:2x2
jax: 0.10.0
libtpu: 0.0.40
codegen_flags: <defaults>
</compile_context>

<pallas_src>
import functools
import math

import jax
import jax.numpy as jnp
from jax.experimental import pallas as pl
from jax.experimental.pallas import tpu as pltpu


def _round_up(x, m):
    return (x + m - 1) // m * m


def _block_cap_bytes():
    """Per-array VMEM block cap (bytes), generation aware."""
    try:
        kind = jax.devices()[0].device_kind.lower()
    except Exception:
        kind = ""
    if "v7" in kind or "tpu7" in kind:
        return 4 << 20        # v7x: 3.2 TB/s HBM, only 64 MiB physical VMEM
    if "v6" in kind:
        return 3 << 20        # v6e: 32 MiB scoped default, 128 MiB physical
    return 2 << 20            # v5e & others: keep 2x-buffered streams small


def _loss_block(pred_ref, tgt_ref, cw_ref, sigma):
    """Elementwise smooth-L1 on one lane-dense (tR, L) block (pure VPU)."""
    diff = pred_ref[...].astype(jnp.float32) - tgt_ref[...].astype(jnp.float32)
    if cw_ref is not None:
        # (1, L) row broadcasts over sublanes (rows of packed anchors) for free.
        diff = diff * cw_ref[...].astype(jnp.float32)
    abs_diff = jnp.abs(diff)
    sig2 = jnp.float32(sigma * sigma)
    thresh = jnp.float32(1.0 / (sigma * sigma))              # 1 / sigma^2
    quad = (jnp.float32(0.5) * sig2) * abs_diff * abs_diff   # 0.5 * (|d|*sigma)^2
    lin = abs_diff - jnp.float32(0.5) * thresh               # |d| - 0.5 / sigma^2
    return jnp.where(abs_diff <= thresh, quad, lin)


def _exact_mask_matmul(x_f32, mask_bf16):
    """x_f32 @ mask, mask in {0,1}, exact to ~f32 precision.

    The f32 operand is split into three bf16 terms so each MXU pass is a
    plain bf16 x bf16 -> f32 matmul (the canonical, always-supported path);
    summing the three passes reconstructs the f32 result exactly enough
    (~2^-24 rel) without depending on `precision=` lowering support.
    """
    x0 = x_f32.astype(jnp.bfloat16)
    r1 = x_f32 - x0.astype(jnp.float32)
    x1 = r1.astype(jnp.bfloat16)
    x2 = (r1 - x1.astype(jnp.float32)).astype(jnp.bfloat16)
    acc = jnp.dot(x0, mask_bf16, preferred_element_type=jnp.float32)
    acc = acc + jnp.dot(x1, mask_bf16, preferred_element_type=jnp.float32)
    acc = acc + jnp.dot(x2, mask_bf16, preferred_element_type=jnp.float32)
    return acc


def _codewise_kernel(*refs, sigma, C, G, has_cw, has_w):
    it = iter(refs)
    pred_ref = next(it)
    tgt_ref = next(it)
    cw_ref = next(it) if has_cw else None
    w_ref = next(it) if has_w else None
    out_ref = next(it)

    loss = _loss_block(pred_ref, tgt_ref, cw_ref, sigma)

    if has_w:
        # Expand compact per-anchor weights (tR, G) -> (tR, L = G*C) on the
        # idle MXU: E[g, l] = 1 iff lane l belongs to anchor g.
        L = G * C
        lane = jax.lax.broadcasted_iota(jnp.int32, (G, L), 1)
        grp = jax.lax.broadcasted_iota(jnp.int32, (G, L), 0) * C
        e = ((lane >= grp) & (lane < grp + C)).astype(jnp.float32)
        w_exp = _exact_mask_matmul(w_ref[...].astype(jnp.float32),
                                   e.astype(jnp.bfloat16))
        loss = loss * w_exp

    out_ref[...] = loss.astype(out_ref.dtype)


def _anchorwise_kernel(*refs, sigma, C, G, has_cw, has_w):
    it = iter(refs)
    pred_ref = next(it)
    tgt_ref = next(it)
    cw_ref = next(it) if has_cw else None
    w_ref = next(it) if has_w else None
    out_ref = next(it)

    loss = _loss_block(pred_ref, tgt_ref, cw_ref, sigma)

    # In-kernel code-dim reduction on the idle MXU: S[l, g] = 1 iff lane l
    # belongs to anchor g.  Output block (tR, G) stays lane-dense and the
    # HBM store shrinks by a factor of C.
    L = G * C
    lane = jax.lax.broadcasted_iota(jnp.int32, (L, G), 0)
    grp = jax.lax.broadcasted_iota(jnp.int32, (L, G), 1) * C
    s = ((lane >= grp) & (lane < grp + C)).astype(jnp.float32)
    red = _exact_mask_matmul(loss, s.astype(jnp.bfloat16))

    if has_w:
        red = red * w_ref[...].astype(jnp.float32)   # (tR, G) elementwise

    out_ref[...] = red.astype(out_ref.dtype)


def weighted_smooth_l1_loss(prediction, target, weights=None, *,
                            sigma=3.0, code_weights=None, codewise=True):
    """Pallas TPU implementation of WeightedSmoothL1Loss.forward.

    prediction, target : [B, A, C] float
    weights            : [B, A] float or None
    returns            : [B, A, C] if codewise (module default) else [B, A]
    """
    B, A, C = prediction.shape
    assert target.shape == (B, A, C)
    if weights is not None:
        assert weights.shape == (B, A)

    dtype = prediction.dtype
    N = B * A
    LANE = 128
    G = LANE // math.gcd(C, LANE)   # anchors packed per slab row
    L = G * C                       # lane width (multiple of 128)
    R = -(-N // G)                  # slab rows
    N_pad = R * G

    # --- tile size: biggest block under the per-generation VMEM cap, while
    # keeping >= 4 grid steps (when possible) so the "parallel" axis can be
    # sharded across both v7x TensorCores.
    itemsize = jnp.dtype(dtype).itemsize
    bytes_per_row = L * itemsize
    tR = max(8, (_block_cap_bytes() // bytes_per_row) // 8 * 8)
    min_steps = 4
    if R >= min_steps * 8:
        tR = min(tR, max(8, (R // min_steps) // 8 * 8))
    tR = min(tR, _round_up(R, 8))
    grid = (pl.cdiv(R, tR),)        # partial tail block is masked by Pallas

    # Flatten [B, A, C] -> (N, C) -> lane-dense (R, L).  Only the small
    # G-alignment pad is ever materialized (skipped when N % G == 0); there
    # is no pad to a tile multiple.
    pred2 = prediction.reshape(N, C)
    tgt2 = target.reshape(N, C)
    if N_pad != N:
        pad = ((0, N_pad - N), (0, 0))
        pred2 = jnp.pad(pred2, pad)
        tgt2 = jnp.pad(tgt2, pad)
    pred2 = pred2.reshape(R, L)
    tgt2 = tgt2.reshape(R, L)

    args = [pred2, tgt2]
    in_specs = [
        pl.BlockSpec((tR, L), lambda r: (r, 0)),
        pl.BlockSpec((tR, L), lambda r: (r, 0)),
    ]

    has_cw = code_weights is not None
    if has_cw:
        cw = jnp.asarray(code_weights, dtype=jnp.float32).reshape(C)
        args.append(jnp.tile(cw, G).reshape(1, L))   # lane l -> cw[l % C]
        in_specs.append(pl.BlockSpec((1, L), lambda r: (0, 0)))

    has_w = weights is not None
    if has_w:
        # Compact per-anchor weights: one f32 per anchor, G per slab row.
        w = weights.reshape(N).astype(jnp.float32)
        if N_pad != N:
            w = jnp.pad(w, (0, N_pad - N))
        args.append(w.reshape(R, G))
        in_specs.append(pl.BlockSpec((tR, G), lambda r: (r, 0)))

    cparams = pltpu.CompilerParams(
        dimension_semantics=("parallel",),
        vmem_limit_bytes=40 << 20,
    )

    if codewise:
        kernel = functools.partial(_codewise_kernel, sigma=float(sigma),
                                   C=C, G=G, has_cw=has_cw, has_w=has_w)
        out2 = pl.pallas_call(
            kernel,
            out_shape=jax.ShapeDtypeStruct((R, L), dtype),
            grid_spec=pltpu.PrefetchScalarGridSpec(
                num_scalar_prefetch=0, grid=grid,
                in_specs=in_specs,
                out_specs=pl.BlockSpec((tR, L), lambda r: (r, 0))),
            compiler_params=cparams,
        )(*args)
        return out2.reshape(N_pad, C)[:N].reshape(B, A, C)

    kernel = functools.partial(_anchorwise_kernel, sigma=float(sigma),
                               C=C, G=G, has_cw=has_cw, has_w=has_w)
    out2 = pl.pallas_call(
        kernel,
        out_shape=jax.ShapeDtypeStruct((R, G), dtype),
        grid_spec=pltpu.PrefetchScalarGridSpec(
            num_scalar_prefetch=0, grid=grid,
            in_specs=in_specs,
            out_specs=pl.BlockSpec((tR, G), lambda r: (r, 0))),
        compiler_params=cparams,
    )(*args)
    return out2.reshape(N_pad)[:N].reshape(B, A)


def _reference(prediction, target, weights=None, sigma=3.0,
               code_weights=None, codewise=True):
    diff = prediction - target
    if code_weights is not None:
        diff = jnp.asarray(code_weights, dtype=diff.dtype).reshape(1, 1, -1) * diff
    abs_diff = jnp.abs(diff)
    lt = (abs_diff <= 1.0 / sigma ** 2).astype(abs_diff.dtype)
    loss = lt * 0.5 * (abs_diff * sigma) ** 2 \
        + (abs_diff - 0.5 / sigma ** 2) * (1.0 - lt)
    if codewise:
        if weights is not None:
            loss = loss * weights[:, :, None]
        return loss
    s = jnp.sum(loss, axis=2)
    if weights is not None:
        s = s * weights
    return s


if __name__ == "__main__":
    key = jax.random.PRNGKey(0)
    k1, k2, k3 = jax.random.split(key, 3)

    B, A, C = 2, 16, 7   # [batch, num_anchors, code_size]
    prediction = jax.random.normal(k1, (B, A, C), dtype=jnp.float32)
    # targets close enough that both smooth-L1 branches get exercised
    target = prediction + 0.5 * jax.random.normal(k2, (B, A, C), dtype=jnp.float32)
    weights = jax.random.uniform(k3, (B, A), dtype=jnp.float32)
    code_weights = jnp.array([1.0, 1.0, 1.0, 1.0, 1.0, 1.0, 0.5], dtype=jnp.float32)

    # 1) full path: weights + code_weights, codewise=True (module default)
    out = jax.block_until_ready(
        weighted_smooth_l1_loss(prediction, target, weights,
                                sigma=3.0, code_weights=code_weights))
    ref = _reference(prediction, target, weights, sigma=3.0,
                     code_weights=code_weights)
    assert out.shape == (B, A, C)
    assert jnp.allclose(out, ref, atol=1e-5, rtol=1e-5), "mismatch (weighted)"

    # 2) specialized path: no weights, no code_weights (2-input kernel)
    out2 = jax.block_until_ready(
        weighted_smooth_l1_loss(prediction, target, sigma=3.0))
    ref2 = _reference(prediction, target, sigma=3.0)
    assert jnp.allclose(out2, ref2, atol=1e-5, rtol=1e-5), "mismatch (unweighted)"

    # 3) codewise=False ([B, A] output, in-kernel code-dim reduction)
    out3 = jax.block_until_ready(
        weighted_smooth_l1_loss(prediction, target, weights, sigma=3.0,
                                code_weights=code_weights, codewise=False))
    ref3 = _reference(prediction, target, weights, sigma=3.0,
                      code_weights=code_weights, codewise=False)
    assert out3.shape == (B, A)
    assert jnp.allclose(out3, ref3, atol=1e-5, rtol=1e-5), "mismatch (codewise=False)"

    # 4) no-pad path: B*A a multiple of G=128 (skips the G-alignment pad)
    B2, A2 = 2, 1024
    kk1, kk2, kk3 = jax.random.split(jax.random.PRNGKey(1), 3)
    p4 = jax.random.normal(kk1, (B2, A2, C), dtype=jnp.float32)
    t4 = p4 + 0.3 * jax.random.normal(kk2, (B2, A2, C), dtype=jnp.float32)
    w4 = jax.random.uniform(kk3, (B2, A2), dtype=jnp.float32)
    out4 = jax.block_until_ready(
        weighted_smooth_l1_loss(p4, t4, w4, sigma=3.0, code_weights=code_weights))
    ref4 = _reference(p4, t4, w4, sigma=3.0, code_weights=code_weights)
    assert jnp.allclose(out4, ref4, atol=1e-5, rtol=1e-5), "mismatch (no-pad)"

    print("KERNEL_OK")
</pallas_src>

<mosaic_0001>
module attributes {stable_mosaic.version = 11 : i64} {
  func.func @_codewise_kernel(%arg0: i32, %arg1: memref<8x896xf32, #tpu.memory_space<vmem>>, %arg2: memref<8x896xf32, #tpu.memory_space<vmem>>, %arg3: memref<1x896xf32, #tpu.memory_space<vmem>>, %arg4: memref<8x128xf32, #tpu.memory_space<vmem>>, %arg5: memref<8x896xf32, #tpu.memory_space<vmem>>) attributes {dimension_semantics = [#tpu.dimension_semantics<parallel>], iteration_bounds = array<i64: 1>, scalar_prefetch = 0 : i64, scratch_operands = 0 : i64, tpu.core_type = #tpu.core_type<tc>, window_params = [{transform_indices = @transform_0, window_bounds = array<i64: 8, 896>}, {transform_indices = @transform_1, window_bounds = array<i64: 8, 896>}, {pipeline_mode = #tpu.pipeline_mode<synchronous>, transform_indices = @transform_2, window_bounds = array<i64: 1, 896>}, {transform_indices = @transform_3, window_bounds = array<i64: 8, 128>}, {transform_indices = @transform_4, window_bounds = array<i64: 8, 896>}]} {
    %c0 = arith.constant 0 : index
    %c0_0 = arith.constant 0 : index
    %0 = vector.load %arg1[%c0, %c0_0] : memref<8x896xf32, #tpu.memory_space<vmem>>, vector<8x896xf32>
    %c0_1 = arith.constant 0 : index
    %c0_2 = arith.constant 0 : index
    %1 = vector.load %arg2[%c0_1, %c0_2] : memref<8x896xf32, #tpu.memory_space<vmem>>, vector<8x896xf32>
    %2 = arith.subf %0, %1 : vector<8x896xf32>
    %c0_3 = arith.constant 0 : index
    %c0_4 = arith.constant 0 : index
    %3 = vector.load %arg3[%c0_3, %c0_4] : memref<1x896xf32, #tpu.memory_space<vmem>>, vector<1x896xf32>
    %4 = vector.broadcast %3 : vector<1x896xf32> to vector<8x896xf32>
    %5 = arith.mulf %2, %4 : vector<8x896xf32>
    %6 = math.absf %5 : vector<8x896xf32>
    %cst = arith.constant 5.000000e-01 : f32
    %cst_5 = arith.constant 9.000000e+00 : f32
    %7 = arith.mulf %cst, %cst_5 : f32
    %8 = vector.broadcast %7 : f32 to vector<8x896xf32>
    %9 = arith.mulf %8, %6 : vector<8x896xf32>
    %10 = arith.mulf %9, %6 : vector<8x896xf32>
    %cst_6 = arith.constant 5.000000e-01 : f32
    %cst_7 = arith.constant 0.111111112 : f32
    %11 = arith.mulf %cst_6, %cst_7 : f32
    %12 = vector.broadcast %11 : f32 to vector<8x896xf32>
    %13 = arith.subf %6, %12 : vector<8x896xf32>
    %cst_8 = arith.constant 0.111111112 : f32
    %14 = vector.broadcast %cst_8 : f32 to vector<8x896xf32>
    %15 = arith.cmpf ole, %6, %14 : vector<8x896xf32>
    %16 = arith.select %15, %10, %13 : vector<8x896xi1>, vector<8x896xf32>
    %17 = tpu.iota {dimensions = array<i32: 1>} : vector<128x896xi32>
    %18 = tpu.iota {dimensions = array<i32: 0>} : vector<128x896xi32>
    %c7_i32 = arith.constant 7 : i32
    %19 = vector.broadcast %c7_i32 : i32 to vector<128x896xi32>
    %20 = arith.muli %18, %19 : vector<128x896xi32>
    %21 = arith.cmpi sge, %17, %20 : vector<128x896xi32>
    %c7_i32_9 = arith.constant 7 : i32
    %22 = vector.broadcast %c7_i32_9 : i32 to vector<128x896xi32>
    %23 = arith.addi %20, %22 : vector<128x896xi32>
    %24 = arith.cmpi slt, %17, %23 : vector<128x896xi32>
    %25 = arith.andi %21, %24 : vector<128x896xi1>
    %26 = arith.extui %25 : vector<128x896xi1> to vector<128x896xi32>
    %27 = arith.sitofp %26 : vector<128x896xi32> to vector<128x896xf32>
    %c0_10 = arith.constant 0 : index
    %c0_11 = arith.constant 0 : index
    %28 = vector.load %arg4[%c0_10, %c0_11] : memref<8x128xf32, #tpu.memory_space<vmem>>, vector<8x128xf32>
    %29 = arith.truncf %27 : vector<128x896xf32> to vector<128x896xbf16>
    %30 = arith.truncf %28 : vector<8x128xf32> to vector<8x128xbf16>
    %31 = arith.extf %30 : vector<8x128xbf16> to vector<8x128xf32>
    %32 = arith.subf %28, %31 : vector<8x128xf32>
    %33 = arith.truncf %32 : vector<8x128xf32> to vector<8x128xbf16>
    %34 = arith.extf %33 : vector<8x128xbf16> to vector<8x128xf32>
    %35 = arith.subf %32, %34 : vector<8x128xf32>
    %36 = arith.truncf %35 : vector<8x128xf32> to vector<8x128xbf16>
    %cst_12 = arith.constant dense<0.000000e+00> : vector<8x896xf32>
    %37 = tpu.matmul %30, %29, %cst_12 {dimension_numbers = #tpu.dot_dimension_numbers<[1], [0], [0], [1], [0, 0, 1, 1], [], []>} : vector<8x128xbf16>, vector<128x896xbf16>, vector<8x896xf32> -> vector<8x896xf32>
    %cst_13 = arith.constant dense<0.000000e+00> : vector<8x896xf32>
    %38 = tpu.matmul %33, %29, %cst_13 {dimension_numbers = #tpu.dot_dimension_numbers<[1], [0], [0], [1], [0, 0, 1, 1], [], []>} : vector<8x128xbf16>, vector<128x896xbf16>, vector<8x896xf32> -> vector<8x896xf32>
    %39 = arith.addf %37, %38 : vector<8x896xf32>
    %cst_14 = arith.constant dense<0.000000e+00> : vector<8x896xf32>
    %40 = tpu.matmul %36, %29, %cst_14 {dimension_numbers = #tpu.dot_dimension_numbers<[1], [0], [0], [1], [0, 0, 1, 1], [], []>} : vector<8x128xbf16>, vector<128x896xbf16>, vector<8x896xf32> -> vector<8x896xf32>
    %41 = arith.addf %39, %40 : vector<8x896xf32>
    %42 = arith.mulf %16, %41 : vector<8x896xf32>
    %c0_15 = arith.constant 0 : index
    %c0_16 = arith.constant 0 : index
    %43 = vector.load %arg5[%c0_15, %c0_16] : memref<8x896xf32, #tpu.memory_space<vmem>>, vector<8x896xf32>
    tpu.vector_store %arg5[%c0_15, %c0_16], %42 {strides = array<i32>} : memref<8x896xf32, #tpu.memory_space<vmem>>, vector<8x896xf32>,
    return
  }
  func.func @transform_0(%arg0: i32) -> (i32, i32) {
    %c0_i32 = arith.constant 0 : i32
    %c0_i32_0 = arith.constant 0 : i32
    return %arg0, %c0_i32 : i32, i32
  }
  func.func @transform_1(%arg0: i32) -> (i32, i32) {
    %c0_i32 = arith.constant 0 : i32
    %c0_i32_0 = arith.constant 0 : i32
    return %arg0, %c0_i32 : i32, i32
  }
  func.func @transform_2(%arg0: i32) -> (i32, i32) {
    %c0_i32 = arith.constant 0 : i32
    %c0_i32_0 = arith.constant 0 : i32
    %c0_i32_1 = arith.constant 0 : i32
    return %c0_i32, %c0_i32_0 : i32, i32
  }
  func.func @transform_3(%arg0: i32) -> (i32, i32) {
    %c0_i32 = arith.constant 0 : i32
    %c0_i32_0 = arith.constant 0 : i32
    return %arg0, %c0_i32 : i32, i32
  }
  func.func @transform_4(%arg0: i32) -> (i32, i32) {
    %c0_i32 = arith.constant 0 : i32
    %c0_i32_0 = arith.constant 0 : i32
    return %arg0, %c0_i32 : i32, i32
  }
}

</mosaic_0001>

<bundles_post_ra>
// kernel: tpu_custom_call.1
= control target key start
LH: loop header
LB: loop body
LE: loop exit
PB: predicated region body
PF: predicated region fallthrough
CT: control target
= control target key end

     0   :  { %9 = vsyncpa [#allocation3], 0  ;;  %s3504_s0 = inlined_call_operand.hbm [shape: f32[1,896], index: 0, kind: input, shape index: {}]   ;;  %s3505_s1 = inlined_call_operand.hbm [shape: f32[1,896], index: 1, kind: input, shape index: {}]   ;;  %s3506_s2 = inlined_call_operand.hbm [shape: f32[1,896], index: 2, kind: input, shape index: {}]   ;;  %s3507_s3 = inlined_call_operand.vmem [shape: f32[1,128], index: 3, kind: input, shape index: {}]   ;;  %s3508_s4 = inlined_call_operand.hbm [shape: f32[1,896], index: 4, kind: output, shape index: {}]  }
   0x1   :  { %10 = vsyncpa [#allocation6], 0 }
   0x2   :  { %11 = vsyncpa [#allocation4], 0 }
   0x3   :  { %15 = vsyncadd [#allocation3], 784  ;;  %s16_s17 = sshll.u32 %s3504_s0, 4  ;;  %s1883_s18 = smov [#allocation2]   ;;  %s17_s17 = int_to_ptr.hbm [resolvable:$true] %s16_s17 }
   0x4   :  { %s18_s19 = sshll.u32 %s1883_s18, 4  ;;  %s1884_s20 = smov 112   ;;  %s19_s19 = int_to_ptr.vmem [resolvable:$true] %s18_s19 }
   0x5   :  { %s1885_s21 = smov 7  }
   0x6   :  { %24 = dma.hbm_to_vmem [thread:$0]  %s17_s17, 112, %s19_s19, [#allocation3], %s1884_s20, %s1884_s20, %s1885_s21  }
   0x7   :  { %28 = vsyncadd [#allocation6], 784  ;;  %s29_s24 = sshll.u32 %s3505_s1, 4  ;;  %s1886_s25 = smov [#allocation5]   ;;  %s30_s24 = int_to_ptr.hbm [resolvable:$true] %s29_s24 }
   0x8   :  { %s31_s26 = sshll.u32 %s1886_s25, 4  ;;  %s43_s28 = sshll.u32 %s3506_s2, 4  ;;  %s32_s26 = int_to_ptr.vmem [resolvable:$true] %s31_s26  ;;  %s44_s28 = int_to_ptr.hbm [resolvable:$true] %s43_s28 }
   0x9   :  { %37 = dma.hbm_to_vmem [thread:$0]  %s30_s24, 112, %s32_s26, [#allocation6], %s1884_s20, %s1884_s20, %s1885_s21  }
   0xa   :  { %s1887_s29 = smov [#allocation7]  }
   0xb   :  { %s45_s30 = sshll.u32 %s1887_s29, 4  ;;  %s46_s30 = int_to_ptr.vmem [resolvable:$true] %s45_s30 }
   0xc   :  { %48 = dma.hbm_to_vmem [thread:$0]  %s44_s28, 112, %s46_s30, [#allocation6]  }
   0xd   :  { %1877 = dma.done.wait [#allocation3], 896  }
   0xe   :  { %1878 = vsyncadd [#allocation3], 4294966400  ;;  %v3551_v0 = vlaneseq }
   0xf   :  { %1879 = dma.done.wait [#allocation6], 1008  }
  0x10   :  { %1880 = vsyncadd [#allocation6], 4294966288  ;;  %v1931_v1 = vshrl.u32 %v3551_v0, 7  ;;  %v1934_v2 = vand.u32 127, %v3551_v0  ;;  %v3628_v14 = vmov 0  ;;  %v3631_v18 = vmov 0 }
  0x11   :  { %v3562_v17 = vmov 1.0|1.0   ;;  %v3633_v21 = vmov 0  ;;  %v3635_v24 = vmov 0  ;;  %v3637_v26 = vmov 0 }
  0x12   :  { %v264_v3 = vadd.s32 112, %v1931_v1  ;;  %v265_v4 = vadd.s32 120, %v1931_v1  ;;  %v1943_v7 = vadd.s32 128, %v1934_v2  ;;  %v262_v10 = vadd.s32 96, %v1931_v1 }
  0x13   :  { %v263_v11 = vadd.s32 104, %v1931_v1  ;;  %v1962_v12 = vadd.s32 256, %v1934_v2  ;;  %v1979_v15 = vadd.s32 384, %v1934_v2  ;;  %v260_v22 = vadd.s32 80, %v1931_v1 }
  0x14   :  { %v1938_v5 = vmul.u32 7, %v264_v3  ;;  %v1940_v6 = vmul.u32 7, %v265_v4  ;;  %v1972_v13 = vmul.u32 7, %v262_v10  ;;  %v261_v23 = vadd.s32 88, %v1931_v1 }
  0x15   :  { %v1981_v16 = vmul.u32 7, %v263_v11  ;;  %v2047_v25 = vmul.u32 7, %v260_v22  ;;  %v3639_v28 = vmov 0  ;;  %v3641_v31 = vmov 0 }
  0x16   :  { %vm380_vm0 = vcmp.ge.s32.totalorder %v1934_v2, %v1938_v5  ;;  %v1948_v8 = vadd.s32 7, %v1938_v5  ;;  %v1951_v9 = vadd.s32 7, %v1940_v6  ;;  %vm387_vm1 = vcmp.ge.s32.totalorder %v1934_v2, %v1940_v6 }
  0x17   :  { %vm381_vm5 = vcmp.ge.s32.totalorder %v1943_v7, %v1938_v5  ;;  %vm388_vm8 = vcmp.ge.s32.totalorder %v1943_v7, %v1940_v6  ;;  %vm382_vm12 = vcmp.ge.s32.totalorder %v1962_v12, %v1938_v5  ;;  %vm389_vm15 = vcmp.ge.s32.totalorder %v1962_v12, %v1940_v6 }
  0x18   :  { %vm508_vm2 = vcmp.lt.s32.totalorder %v1934_v2, %v1948_v8  ;;  %vm515_vm3 = vcmp.lt.s32.totalorder %v1934_v2, %v1951_v9  ;;  %vm509_vm6 = vcmp.lt.s32.totalorder %v1943_v7, %v1948_v8  ;;  %vm516_vm9 = vcmp.lt.s32.totalorder %v1943_v7, %v1951_v9 }
  0x19   :  { %vm620_vm4 = vmand %vm380_vm0, %vm508_vm2  ;;  %vm510_vm13 = vcmp.lt.s32.totalorder %v1962_v12, %v1948_v8  ;;  %vm517_vm0 = vcmp.lt.s32.totalorder %v1962_v12, %v1951_v9  ;;  %v1999_v19 = vadd.s32 7, %v1972_v13  ;;  %v2009_v20 = vadd.s32 7, %v1981_v16 }
  0x1a   :  { %vm627_vm7 = vmand %vm387_vm1, %vm515_vm3  ;;  %vm383_vm3 = vcmp.ge.s32.totalorder %v1979_v15, %v1938_v5  ;;  %v2053_v27 = vmul.u32 7, %v261_v23  ;;  %v2071_v29 = vadd.s32 7, %v2047_v25  ;;  %v258_v32 = vadd.s32 64, %v1931_v1 }
  0x1b   :  { %vm1974_vm10 = vmpackc.low %vm627_vm7, %vm620_vm4  ;;  %vm511_vm4 = vcmp.lt.s32.totalorder %v1979_v15, %v1948_v8  ;;  %vm518_vm7 = vcmp.lt.s32.totalorder %v1979_v15, %v1951_v9  ;;  %v259_v33 = vadd.s32 72, %v1931_v1  ;;  %v3643_v34 = vmov 0 }
  0x1c   :  { %v3629_v14 = vsel %vm1974_vm10, 4294967295, %v3628_v14  ;;  %1439 = vmatpush.bf16.msk.msra.mxu0 %vm1974_vm10, %v3562_v17  ;;  %vm621_vm11 = vmand %vm381_vm5, %vm509_vm6  ;;  %vm390_vm6 = vcmp.ge.s32.totalorder %v1979_v15, %v1940_v6  ;;  %v2081_v30 = vadd.s32 7, %v2053_v27  ;;  %v2119_v35 = vmul.u32 7, %v258_v32 }
  0x1d   :  { %3630 = vst [vmem:[#allocation12_spill] sm:$0xff] %v3629_v14  ;;  %vm628_vm14 = vmand %vm388_vm8, %vm516_vm9  ;;  %v3645_v36 = vmov 0  ;;  %v2125_v37 = vmul.u32 7, %v259_v33  ;;  %v3647_v38 = vmov 0  ;;  %v3649_v41 = vmov 0 }
  0x1e   :  { %vm1994_vm1 = vmpackc.low %vm628_vm14, %vm621_vm11  ;;  %vm366_vm11 = vcmp.ge.s32.totalorder %v1934_v2, %v1972_v13  ;;  %vm373_vm14 = vcmp.ge.s32.totalorder %v1934_v2, %v1981_v16  ;;  %v2143_v39 = vadd.s32 7, %v2119_v35  ;;  %v256_v42 = vadd.s32 48, %v1931_v1 }
  0x1f   :  { %v3632_v18 = vsel %vm1994_vm1, 4294967295, %v3631_v18  ;;  %1455 = vmatpush.bf16.msk.msra.mxu1 %vm1994_vm1, %v3562_v17  ;;  %vm622_vm2 = vmand %vm382_vm12, %vm510_vm13  ;;  %vm494_vm12 = vcmp.lt.s32.totalorder %v1934_v2, %v1999_v19  ;;  %v2153_v40 = vadd.s32 7, %v2125_v37  ;;  %v257_v43 = vadd.s32 56, %v1931_v1 }
  0x20   :  { %vm629_vm5 = vmand %vm389_vm15, %vm517_vm0  ;;  %vm501_vm15 = vcmp.lt.s32.totalorder %v1934_v2, %v2009_v20  ;;  %v3651_v44 = vmov 0  ;;  %v2191_v45 = vmul.u32 7, %v256_v42  ;;  %v3653_v46 = vmov 0 }
  0x21   :  { %vm2015_vm8 = vmpackc.low %vm629_vm5, %vm622_vm2  ;;  %v2197_v47 = vmul.u32 7, %v257_v43  ;;  %v3655_v48 = vmov 0  ;;  %v3657_v51 = vmov 0  ;;  %v254_v52 = vadd.s32 32, %v1931_v1 }
  0x22   :  { %v3634_v21 = vsel %vm2015_vm8, 4294967295, %v3633_v21  ;;  %1471 = vmatpush.bf16.msk.msra.mxu2 %vm2015_vm8, %v3562_v17  ;;  %vm623_vm9 = vmand %vm383_vm3, %vm511_vm4  ;;  %vm367_vm3 = vcmp.ge.s32.totalorder %v1943_v7, %v1972_v13  ;;  %vm495_vm4 = vcmp.lt.s32.totalorder %v1943_v7, %v1999_v19  ;;  %v2215_v49 = vadd.s32 7, %v2191_v45 }
  0x23   :  { %vm630_vm13 = vmand %vm390_vm6, %vm518_vm7  ;;  %vm374_vm6 = vcmp.ge.s32.totalorder %v1943_v7, %v1981_v16  ;;  %vm502_vm7 = vcmp.lt.s32.totalorder %v1943_v7, %v2009_v20  ;;  %v2225_v50 = vadd.s32 7, %v2197_v47  ;;  %v255_v53 = vadd.s32 40, %v1931_v1 }
  0x24   :  { %vm2032_vm0 = vmpackc.low %vm630_vm13, %vm623_vm9  ;;  %vm496_vm13 = vcmp.lt.s32.totalorder %v1962_v12, %v1999_v19  ;;  %v3659_v54 = vmov 0  ;;  %v2263_v55 = vmul.u32 7, %v254_v52  ;;  %v3661_v56 = vmov 0 }
  0x25   :  { %v3636_v24 = vsel %vm2032_vm0, 4294967295, %v3635_v24  ;;  %1487 = vmatpush.bf16.msk.msra.mxu3 %vm2032_vm0, %v3562_v17  ;;  %vm606_vm2 = vmand %vm366_vm11, %vm494_vm12  ;;  %vm368_vm12 = vcmp.ge.s32.totalorder %v1962_v12, %v1972_v13  ;;  %v2269_v57 = vmul.u32 7, %v255_v53  ;;  %v3663_v58 = vmov 0 }
  0x26   :  { %vm613_vm5 = vmand %vm373_vm14, %vm501_vm15  ;;  %vm375_vm15 = vcmp.ge.s32.totalorder %v1962_v12, %v1981_v16  ;;  %v2287_v59 = vadd.s32 7, %v2263_v55  ;;  %v3665_v61 = vmov 0  ;;  %v252_v62 = vadd.s32 16, %v1931_v1 }
  0x27   :  { %vm2049_vm9 = vmpackc.low %vm613_vm5, %vm606_vm2  ;;  %vm503_vm2 = vcmp.lt.s32.totalorder %v1962_v12, %v2009_v20  ;;  %v2297_v60 = vadd.s32 7, %v2269_v57  ;;  %v253_v63 = vadd.s32 24, %v1931_v1  ;;  %v3667_v3 = vmov 0 }
  0x28   :  { %v3638_v26 = vsel %vm2049_vm9, 4294967295, %v3637_v26  ;;  %1441 = vmatpush.bf16.msk.msra.mxu0 %vm2049_vm9, %v3562_v17  ;;  %vm607_vm11 = vmand %vm367_vm3, %vm495_vm4  ;;  %vm369_vm4 = vcmp.ge.s32.totalorder %v1979_v15, %v1972_v13  ;;  %v2335_v4 = vmul.u32 7, %v252_v62  ;;  %v3670_v10 = vmov 0 }
  0x29   :  { %vm614_vm14 = vmand %vm374_vm6, %vm502_vm7  ;;  %vm497_vm6 = vcmp.lt.s32.totalorder %v1979_v15, %v1999_v19  ;;  %v2341_v11 = vmul.u32 7, %v253_v63  ;;  %v3672_v22 = vmov 0  ;;  %v3674_v33 = vmov 0 }
  0x2a   :  { %vm2066_vm5 = vmpackc.low %vm614_vm14, %vm607_vm11  ;;  %vm376_vm11 = vcmp.ge.s32.totalorder %v1979_v15, %v1981_v16  ;;  %vm504_vm14 = vcmp.lt.s32.totalorder %v1979_v15, %v2009_v20  ;;  %v2359_v23 = vadd.s32 7, %v2335_v4  ;;  %v251_v42 = vadd.s32 8, %v1931_v1 }
  0x2b   :  { %v3640_v28 = vsel %vm2066_vm5, 4294967295, %v3639_v28  ;;  %1457 = vmatpush.bf16.msk.msra.mxu1 %vm2066_vm5, %v3562_v17  ;;  %vm608_vm3 = vmand %vm368_vm12, %vm496_vm13  ;;  %vm352_vm13 = vcmp.ge.s32.totalorder %v1934_v2, %v2047_v25  ;;  %v2369_v32 = vadd.s32 7, %v2341_v11  ;;  %v3677_v43 = vmov 0 }
  0x2c   :  { %vm615_vm7 = vmand %vm375_vm15, %vm503_vm2  ;;  %vm480_vm15 = vcmp.lt.s32.totalorder %v1934_v2, %v2071_v29  ;;  %v2407_v52 = vmul.u32 7, %v1931_v1  ;;  %v3680_v53 = vmov 0  ;;  %v2413_v62 = vmul.u32 7, %v251_v42 }
  0x2d   :  { %vm2087_vm0 = vmpackc.low %vm615_vm7, %vm608_vm3  ;;  %vm359_vm3 = vcmp.ge.s32.totalorder %v1934_v2, %v2053_v27  ;;  %vm487_vm7 = vcmp.lt.s32.totalorder %v1934_v2, %v2081_v30  ;;  %v3682_v1 = vmov 0  ;;  %v3685_v0 = vmov 0 }
  0x2e   :  { %v3642_v31 = vsel %vm2087_vm0, 4294967295, %v3641_v31  ;;  %1473 = vmatpush.bf16.msk.msra.mxu2 %vm2087_vm0, %v3562_v17  ;;  %vm609_vm12 = vmand %vm369_vm4, %vm497_vm6  ;;  %vm353_vm6 = vcmp.ge.s32.totalorder %v1943_v7, %v2047_v25  ;;  %vm360_vm0 = vcmp.ge.s32.totalorder %v1943_v7, %v2053_v27  ;;  %v2431_v63 = vadd.s32 7, %v2407_v52 }
  0x2f   :  { %vm616_vm2 = vmand %vm376_vm11, %vm504_vm14  ;;  %vm481_vm11 = vcmp.lt.s32.totalorder %v1943_v7, %v2071_v29  ;;  %v2441_v42 = vadd.s32 7, %v2413_v62  ;;  %v3705_v14 = vmov 0 }
  0x30   :  { %vm2104_vm5 = vmpackc.low %vm616_vm2, %vm609_vm12  ;;  %vm488_vm12 = vcmp.lt.s32.totalorder %v1943_v7, %v2081_v30 }
  0x31   :  { %v3644_v34 = vsel %vm2104_vm5, 4294967295, %v3643_v34  ;;  %1489 = vmatpush.bf16.msk.msra.mxu3 %vm2104_vm5, %v3562_v17  ;;  %vm592_vm4 = vmand %vm352_vm13, %vm480_vm15  ;;  %vm354_vm15 = vcmp.ge.s32.totalorder %v1962_v12, %v2047_v25 }
  0x32   :  { %vm599_vm14 = vmand %vm359_vm3, %vm487_vm7  ;;  %vm482_vm3 = vcmp.lt.s32.totalorder %v1962_v12, %v2071_v29 }
  0x33   :  { %vm2121_vm2 = vmpackc.low %vm599_vm14, %vm592_vm4  ;;  %vm361_vm4 = vcmp.ge.s32.totalorder %v1962_v12, %v2053_v27  ;;  %vm489_vm14 = vcmp.lt.s32.totalorder %v1962_v12, %v2081_v30 }
  0x34   :  { %v3646_v36 = vsel %vm2121_vm2, 4294967295, %v3645_v36  ;;  %1443 = vmatpush.bf16.msk.msra.mxu0 %vm2121_vm2, %v3562_v17  ;;  %vm593_vm13 = vmand %vm353_vm6, %vm481_vm11  ;;  %vm483_vm11 = vcmp.lt.s32.totalorder %v1979_v15, %v2071_v29 }
  0x35   :  { %vm600_vm7 = vmand %vm360_vm0, %vm488_vm12  ;;  %vm355_vm0 = vcmp.ge.s32.totalorder %v1979_v15, %v2047_v25 }
  0x36   :  { %vm2138_vm5 = vmpackc.low %vm600_vm7, %vm593_vm13  ;;  %vm362_vm13 = vcmp.ge.s32.totalorder %v1979_v15, %v2053_v27  ;;  %vm490_vm7 = vcmp.lt.s32.totalorder %v1979_v15, %v2081_v30 }
  0x37   :  { %v3648_v38 = vsel %vm2138_vm5, 4294967295, %v3647_v38  ;;  %1459 = vmatpush.bf16.msk.msra.mxu1 %vm2138_vm5, %v3562_v17  ;;  %vm594_vm6 = vmand %vm354_vm15, %vm482_vm3  ;;  %vm338_vm3 = vcmp.ge.s32.totalorder %v1934_v2, %v2119_v35 }
  0x38   :  { %vm601_vm12 = vmand %vm361_vm4, %vm489_vm14  ;;  %vm466_vm4 = vcmp.lt.s32.totalorder %v1934_v2, %v2143_v39 }
  0x39   :  { %vm2159_vm8 = vmpackc.low %vm601_vm12, %vm594_vm6  ;;  %vm345_vm6 = vcmp.ge.s32.totalorder %v1934_v2, %v2125_v37  ;;  %vm473_vm12 = vcmp.lt.s32.totalorder %v1934_v2, %v2153_v40 }
  0x3a   :  { %v3650_v41 = vsel %vm2159_vm8, 4294967295, %v3649_v41  ;;  %1475 = vmatpush.bf16.msk.msra.mxu2 %vm2159_vm8, %v3562_v17  ;;  %vm595_vm15 = vmand %vm355_vm0, %vm483_vm11  ;;  %vm339_vm11 = vcmp.ge.s32.totalorder %v1943_v7, %v2119_v35  ;;  %vm346_vm8 = vcmp.ge.s32.totalorder %v1943_v7, %v2125_v37 }
  0x3b   :  { %vm602_vm14 = vmand %vm362_vm13, %vm490_vm7  ;;  %vm467_vm13 = vcmp.lt.s32.totalorder %v1943_v7, %v2143_v39 }
  0x3c   :  { %vm2176_vm5 = vmpackc.low %vm602_vm14, %vm595_vm15  ;;  %vm474_vm15 = vcmp.lt.s32.totalorder %v1943_v7, %v2153_v40 }
  0x3d   :  { %v3652_v44 = vsel %vm2176_vm5, 4294967295, %v3651_v44  ;;  %1491 = vmatpush.bf16.msk.msra.mxu3 %vm2176_vm5, %v3562_v17  ;;  %vm578_vm0 = vmand %vm338_vm3, %vm466_vm4  ;;  %vm340_vm4 = vcmp.ge.s32.totalorder %v1962_v12, %v2119_v35 }
  0x3e   :  { %vm585_vm7 = vmand %vm345_vm6, %vm473_vm12  ;;  %vm468_vm6 = vcmp.lt.s32.totalorder %v1962_v12, %v2143_v39 }
  0x3f   :  { %vm2193_vm14 = vmpackc.low %vm585_vm7, %vm578_vm0  ;;  %vm347_vm0 = vcmp.ge.s32.totalorder %v1962_v12, %v2125_v37  ;;  %vm475_vm7 = vcmp.lt.s32.totalorder %v1962_v12, %v2153_v40 }
  0x40   :  { %v3654_v46 = vsel %vm2193_vm14, 4294967295, %v3653_v46  ;;  %1445 = vmatpush.bf16.msk.msra.mxu0 %vm2193_vm14, %v3562_v17  ;;  %vm579_vm3 = vmand %vm339_vm11, %vm467_vm13  ;;  %vm469_vm13 = vcmp.lt.s32.totalorder %v1979_v15, %v2143_v39 }
  0x41   :  { %vm586_vm12 = vmand %vm346_vm8, %vm474_vm15  ;;  %vm341_vm8 = vcmp.ge.s32.totalorder %v1979_v15, %v2119_v35 }
  0x42   :  { %vm2210_vm5 = vmpackc.low %vm586_vm12, %vm579_vm3  ;;  %vm348_vm3 = vcmp.ge.s32.totalorder %v1979_v15, %v2125_v37  ;;  %vm476_vm12 = vcmp.lt.s32.totalorder %v1979_v15, %v2153_v40 }
  0x43   :  { %v3656_v48 = vsel %vm2210_vm5, 4294967295, %v3655_v48  ;;  %1461 = vmatpush.bf16.msk.msra.mxu1 %vm2210_vm5, %v3562_v17  ;;  %vm580_vm11 = vmand %vm340_vm4, %vm468_vm6  ;;  %vm324_vm6 = vcmp.ge.s32.totalorder %v1934_v2, %v2191_v45 }
  0x44   :  { %vm587_vm15 = vmand %vm347_vm0, %vm475_vm7  ;;  %vm452_vm0 = vcmp.lt.s32.totalorder %v1934_v2, %v2215_v49 }
  0x45   :  { %vm2231_vm1 = vmpackc.low %vm587_vm15, %vm580_vm11  ;;  %vm331_vm11 = vcmp.ge.s32.totalorder %v1934_v2, %v2197_v47  ;;  %vm459_vm15 = vcmp.lt.s32.totalorder %v1934_v2, %v2225_v50 }
  0x46   :  { %v3658_v51 = vsel %vm2231_vm1, 4294967295, %v3657_v51  ;;  %1477 = vmatpush.bf16.msk.msra.mxu2 %vm2231_vm1, %v3562_v17  ;;  %vm581_vm4 = vmand %vm341_vm8, %vm469_vm13  ;;  %vm325_vm13 = vcmp.ge.s32.totalorder %v1943_v7, %v2191_v45  ;;  %vm332_vm1 = vcmp.ge.s32.totalorder %v1943_v7, %v2197_v47 }
  0x47   :  { %vm588_vm7 = vmand %vm348_vm3, %vm476_vm12  ;;  %vm453_vm3 = vcmp.lt.s32.totalorder %v1943_v7, %v2215_v49 }
  0x48   :  { %vm2248_vm5 = vmpackc.low %vm588_vm7, %vm581_vm4  ;;  %vm460_vm4 = vcmp.lt.s32.totalorder %v1943_v7, %v2225_v50 }
  0x49   :  { %v3660_v54 = vsel %vm2248_vm5, 4294967295, %v3659_v54  ;;  %1493 = vmatpush.bf16.msk.msra.mxu3 %vm2248_vm5, %v3562_v17  ;;  %vm564_vm8 = vmand %vm324_vm6, %vm452_vm0  ;;  %vm326_vm0 = vcmp.ge.s32.totalorder %v1962_v12, %v2191_v45 }
  0x4a   :  { %vm571_vm12 = vmand %vm331_vm11, %vm459_vm15  ;;  %vm454_vm11 = vcmp.lt.s32.totalorder %v1962_v12, %v2215_v49 }
  0x4b   :  { %vm2265_vm7 = vmpackc.low %vm571_vm12, %vm564_vm8  ;;  %vm333_vm8 = vcmp.ge.s32.totalorder %v1962_v12, %v2197_v47  ;;  %vm461_vm12 = vcmp.lt.s32.totalorder %v1962_v12, %v2225_v50 }
  0x4c   :  { %v3662_v56 = vsel %vm2265_vm7, 4294967295, %v3661_v56  ;;  %1447 = vmatpush.bf16.msk.msra.mxu0 %vm2265_vm7, %v3562_v17  ;;  %vm565_vm6 = vmand %vm325_vm13, %vm453_vm3  ;;  %vm455_vm3 = vcmp.lt.s32.totalorder %v1979_v15, %v2215_v49 }
  0x4d   :  { %vm572_vm15 = vmand %vm332_vm1, %vm460_vm4  ;;  %vm327_vm1 = vcmp.ge.s32.totalorder %v1979_v15, %v2191_v45 }
  0x4e   :  { %vm2282_vm5 = vmpackc.low %vm572_vm15, %vm565_vm6  ;;  %vm334_vm6 = vcmp.ge.s32.totalorder %v1979_v15, %v2197_v47  ;;  %vm462_vm15 = vcmp.lt.s32.totalorder %v1979_v15, %v2225_v50 }
  0x4f   :  { %v3664_v58 = vsel %vm2282_vm5, 4294967295, %v3663_v58  ;;  %1463 = vmatpush.bf16.msk.msra.mxu1 %vm2282_vm5, %v3562_v17  ;;  %vm566_vm13 = vmand %vm326_vm0, %vm454_vm11  ;;  %vm310_vm11 = vcmp.ge.s32.totalorder %v1934_v2, %v2263_v55 }
  0x50   :  { %vm573_vm4 = vmand %vm333_vm8, %vm461_vm12  ;;  %vm438_vm8 = vcmp.lt.s32.totalorder %v1934_v2, %v2287_v59 }
  0x51   :  { %vm2303_vm7 = vmpackc.low %vm573_vm4, %vm566_vm13  ;;  %vm317_vm13 = vcmp.ge.s32.totalorder %v1934_v2, %v2269_v57  ;;  %vm445_vm4 = vcmp.lt.s32.totalorder %v1934_v2, %v2297_v60 }
  0x52   :  { %v3666_v61 = vsel %vm2303_vm7, 4294967295, %v3665_v61  ;;  %1479 = vmatpush.bf16.msk.msra.mxu2 %vm2303_vm7, %v3562_v17  ;;  %vm567_vm0 = vmand %vm327_vm1, %vm455_vm3  ;;  %vm311_vm3 = vcmp.ge.s32.totalorder %v1943_v7, %v2263_v55  ;;  %vm318_vm7 = vcmp.ge.s32.totalorder %v1943_v7, %v2269_v57 }
  0x53   :  { %vm574_vm12 = vmand %vm334_vm6, %vm462_vm15  ;;  %vm439_vm6 = vcmp.lt.s32.totalorder %v1943_v7, %v2287_v59 }
  0x54   :  { %vm2320_vm5 = vmpackc.low %vm574_vm12, %vm567_vm0  ;;  %vm446_vm0 = vcmp.lt.s32.totalorder %v1943_v7, %v2297_v60 }
  0x55   :  { %v3668_v3 = vsel %vm2320_vm5, 4294967295, %v3667_v3  ;;  %1495 = vmatpush.bf16.msk.msra.mxu3 %vm2320_vm5, %v3562_v17  ;;  %vm550_vm1 = vmand %vm310_vm11, %vm438_vm8  ;;  %vm312_vm8 = vcmp.ge.s32.totalorder %v1962_v12, %v2263_v55 }
  0x56   :  { %3669 = vst [vmem:[#allocation13_spill] sm:$0xff] %v3668_v3  ;;  %vm557_vm15 = vmand %vm317_vm13, %vm445_vm4  ;;  %vm440_vm13 = vcmp.lt.s32.totalorder %v1962_v12, %v2287_v59 }
  0x57   :  { %vm2337_vm12 = vmpackc.low %vm557_vm15, %vm550_vm1  ;;  %vm319_vm1 = vcmp.ge.s32.totalorder %v1962_v12, %v2269_v57  ;;  %vm447_vm15 = vcmp.lt.s32.totalorder %v1962_v12, %v2297_v60 }
  0x58   :  { %v3671_v10 = vsel %vm2337_vm12, 4294967295, %v3670_v10  ;;  %1449 = vmatpush.bf16.msk.msra.mxu0 %vm2337_vm12, %v3562_v17  ;;  %vm551_vm11 = vmand %vm311_vm3, %vm439_vm6  ;;  %vm441_vm6 = vcmp.lt.s32.totalorder %v1979_v15, %v2287_v59 }
  0x59   :  { %vm558_vm4 = vmand %vm318_vm7, %vm446_vm0  ;;  %vm313_vm7 = vcmp.ge.s32.totalorder %v1979_v15, %v2263_v55 }
  0x5a   :  { %vm2354_vm5 = vmpackc.low %vm558_vm4, %vm551_vm11  ;;  %vm320_vm11 = vcmp.ge.s32.totalorder %v1979_v15, %v2269_v57  ;;  %vm448_vm4 = vcmp.lt.s32.totalorder %v1979_v15, %v2297_v60 }
  0x5b   :  { %v3673_v22 = vsel %vm2354_vm5, 4294967295, %v3672_v22  ;;  %1465 = vmatpush.bf16.msk.msra.mxu1 %vm2354_vm5, %v3562_v17  ;;  %vm552_vm3 = vmand %vm312_vm8, %vm440_vm13  ;;  %vm296_vm13 = vcmp.ge.s32.totalorder %v1934_v2, %v2335_v4  ;;  %vm303_vm5 = vcmp.ge.s32.totalorder %v1934_v2, %v2341_v11 }
  0x5c   :  { %vm559_vm0 = vmand %vm319_vm1, %vm447_vm15  ;;  %vm424_vm1 = vcmp.lt.s32.totalorder %v1934_v2, %v2359_v23 }
  0x5d   :  { %vm2375_vm12 = vmpackc.low %vm559_vm0, %vm552_vm3  ;;  %vm431_vm3 = vcmp.lt.s32.totalorder %v1934_v2, %v2369_v32 }
  0x5e   :  { %v3675_v33 = vsel %vm2375_vm12, 4294967295, %v3674_v33  ;;  %1481 = vmatpush.bf16.msk.msra.mxu2 %vm2375_vm12, %v3562_v17  ;;  %vm553_vm8 = vmand %vm313_vm7, %vm441_vm6  ;;  %vm297_vm6 = vcmp.ge.s32.totalorder %v1943_v7, %v2335_v4  ;;  %vm304_vm12 = vcmp.ge.s32.totalorder %v1943_v7, %v2341_v11 }
  0x5f   :  { %3676 = vst [vmem:[#allocation14_spill] sm:$0xff] %v3675_v33  ;;  %vm560_vm15 = vmand %vm320_vm11, %vm448_vm4  ;;  %vm425_vm11 = vcmp.lt.s32.totalorder %v1943_v7, %v2359_v23 }
  0x60   :  { %vm2391_vm0 = vmpackc.low %vm560_vm15, %vm553_vm8  ;;  %vm432_vm8 = vcmp.lt.s32.totalorder %v1943_v7, %v2369_v32 }
  0x61   :  { %v3678_v43 = vsel %vm2391_vm0, 4294967295, %v3677_v43  ;;  %1497 = vmatpush.bf16.msk.msra.mxu3 %vm2391_vm0, %v3562_v17  ;;  %vm536_vm7 = vmand %vm296_vm13, %vm424_vm1  ;;  %vm298_vm13 = vcmp.ge.s32.totalorder %v1962_v12, %v2335_v4  ;;  %vm426_vm1 = vcmp.lt.s32.totalorder %v1962_v12, %v2359_v23 }
  0x62   :  { %3679 = vst [vmem:[#allocation15_spill] sm:$0xff] %v3678_v43  ;;  %vm543_vm4 = vmand %vm303_vm5, %vm431_vm3  ;;  %v3688_v43 = vmov 0 }
  0x63   :  { %vm2409_vm15 = vmpackc.low %vm543_vm4, %vm536_vm7  ;;  %vm305_vm7 = vcmp.ge.s32.totalorder %v1962_v12, %v2341_v11  ;;  %vm433_vm4 = vcmp.lt.s32.totalorder %v1962_v12, %v2369_v32 }
  0x64   :  { %v3681_v53 = vsel %vm2409_vm15, 4294967295, %v3680_v53  ;;  %1451 = vmatpush.bf16.msk.msra.mxu0 %vm2409_vm15, %v3562_v17  ;;  %vm537_vm5 = vmand %vm297_vm6, %vm425_vm11  ;;  %vm427_vm11 = vcmp.lt.s32.totalorder %v1979_v15, %v2359_v23 }
  0x65   :  { %vm544_vm3 = vmand %vm304_vm12, %vm432_vm8  ;;  %vm299_vm12 = vcmp.ge.s32.totalorder %v1979_v15, %v2335_v4 }
  0x66   :  { %vm2426_vm0 = vmpackc.low %vm544_vm3, %vm537_vm5  ;;  %vm306_vm5 = vcmp.ge.s32.totalorder %v1979_v15, %v2341_v11  ;;  %vm434_vm3 = vcmp.lt.s32.totalorder %v1979_v15, %v2369_v32 }
  0x67   :  { %v3683_v1 = vsel %vm2426_vm0, 4294967295, %v3682_v1  ;;  %1467 = vmatpush.bf16.msk.msra.mxu1 %vm2426_vm0, %v3562_v17  ;;  %vm538_vm6 = vmand %vm298_vm13, %vm426_vm1  ;;  %vm282_vm1 = vcmp.ge.s32.totalorder %v1934_v2, %v2407_v52  ;;  %vm289_vm0 = vcmp.ge.s32.totalorder %v1934_v2, %v2413_v62 }
  0x68   :  { %3684 = vst [vmem:[#allocation16_spill] sm:$0xff] %v3683_v1  ;;  %vm545_vm8 = vmand %vm305_vm7, %vm433_vm4  ;;  %vm410_vm7 = vcmp.lt.s32.totalorder %v1934_v2, %v2431_v63  ;;  %v2536_v1 = vadd.s32 768, %v1934_v2 }
  0x69   :  { %vm2447_vm15 = vmpackc.low %vm545_vm8, %vm538_vm6  ;;  %vm417_vm6 = vcmp.lt.s32.totalorder %v1934_v2, %v2441_v42 }
  0x6a   :  { %v3686_v0 = vsel %vm2447_vm15, 4294967295, %v3685_v0  ;;  %1483 = vmatpush.bf16.msk.msra.mxu2 %vm2447_vm15, %v3562_v17  ;;  %vm539_vm13 = vmand %vm299_vm12, %vm427_vm11  ;;  %vm283_vm11 = vcmp.ge.s32.totalorder %v1943_v7, %v2407_v52  ;;  %vm290_vm15 = vcmp.ge.s32.totalorder %v1943_v7, %v2413_v62 }
  0x6b   :  { %3687 = vst [vmem:[#allocation17_spill] sm:$0xff] %v3686_v0  ;;  %vm546_vm4 = vmand %vm306_vm5, %vm434_vm3  ;;  %vm411_vm5 = vcmp.lt.s32.totalorder %v1943_v7, %v2431_v63  ;;  %v3691_v0 = vmov 0 }
  0x6c   :  { %vm2462_vm8 = vmpackc.low %vm546_vm4, %vm539_vm13  ;;  %vm418_vm13 = vcmp.lt.s32.totalorder %v1943_v7, %v2441_v42  ;;  %v3693_v7 = vmov 0 }
  0x6d   :  { %v3689_v43 = vsel %vm2462_vm8, 4294967295, %v3688_v43  ;;  %1499 = vmatpush.bf16.msk.msra.mxu3 %vm2462_vm8, %v3562_v17  ;;  %vm522_vm12 = vmand %vm282_vm1, %vm410_vm7  ;;  %vm284_vm7 = vcmp.ge.s32.totalorder %v1962_v12, %v2407_v52  ;;  %vm291_vm8 = vcmp.ge.s32.totalorder %v1962_v12, %v2413_v62 }
  0x6e   :  { %3690 = vst [vmem:[#allocation18_spill] sm:$0xff] %v3689_v43  ;;  %vm529_vm3 = vmand %vm289_vm0, %vm417_vm6  ;;  %vm412_vm0 = vcmp.lt.s32.totalorder %v1962_v12, %v2431_v63  ;;  %v3696_v43 = vmov 1.0|1.0  }
  0x6f   :  { %vm2477_vm4 = vmpackc.low %vm529_vm3, %vm522_vm12  ;;  %vm419_vm12 = vcmp.lt.s32.totalorder %v1962_v12, %v2441_v42  ;;  %v3697_v12 = vmov 0 }
  0x70   :  { %v3692_v0 = vsel %vm2477_vm4, 4294967295, %v3691_v0  ;;  %1453 = vmatpush.bf16.msk.msra.mxu0 %vm2477_vm4, %v3562_v17  ;;  %vm523_vm1 = vmand %vm283_vm11, %vm411_vm5  ;;  %v2497_v17 = vadd.s32 512, %v1934_v2  ;;  %vm413_vm5 = vcmp.lt.s32.totalorder %v1979_v15, %v2431_v63 }
  0x71   :  { %vm530_vm6 = vmand %vm290_vm15, %vm418_vm13  ;;  %vm285_vm15 = vcmp.ge.s32.totalorder %v1979_v15, %v2407_v52 }
  0x72   :  { %vm2492_vm3 = vmpackc.low %vm530_vm6, %vm523_vm1  ;;  %vm292_vm1 = vcmp.ge.s32.totalorder %v1979_v15, %v2413_v62  ;;  %vm420_vm6 = vcmp.lt.s32.totalorder %v1979_v15, %v2441_v42  ;;  %v634_v15 = vld [vmem:[%s3507_s3] sm:$0xff] }
  0x73   :  { %v3694_v7 = vsel %vm2492_vm3, 4294967295, %v3693_v7  ;;  %1469 = vmatpush.bf16.msk.msra.mxu1 %vm2492_vm3, %v3696_v43  ;;  %vm524_vm11 = vmand %vm284_vm7, %vm412_vm0  ;;  %vm512_vm0 = vcmp.lt.s32.totalorder %v2497_v17, %v1948_v8  ;;  %v2538_v33 = vpack.c.bf16 %v634_v15, %v634_v15 }
  0x74   :  { %3695 = vst [vmem:[#allocation19_spill] sm:$0xff] %v3694_v7  ;;  %vm531_vm13 = vmand %vm291_vm8, %vm419_vm12  ;;  %v2515_v7 = vadd.s32 640, %v1934_v2  ;;  %vm384_vm8 = vcmp.ge.s32.totalorder %v2497_v17, %v1938_v5 }
  0x75   :  { %vm2510_vm4 = vmpackc.low %vm531_vm13, %vm524_vm11  ;;  %vm391_vm11 = vcmp.ge.s32.totalorder %v2497_v17, %v1940_v6  ;;  %vm519_vm13 = vcmp.lt.s32.totalorder %v2497_v17, %v1951_v9  ;;  %v916_v2 = vunpack.c.l.bf16 %v2538_v33 }
  0x76   :  { %v3698_v12 = vsel %vm2510_vm4, 4294967295, %v3697_v12  ;;  %1485 = vmatpush.bf16.msk.msra.mxu2 %vm2510_vm4, %v3696_v43  ;;  %vm525_vm7 = vmand %vm285_vm15, %vm413_vm5  ;;  %vm385_vm5 = vcmp.ge.s32.totalorder %v2515_v7, %v1938_v5  ;;  %vm363_vm4 = vcmp.ge.s32.totalorder %v2497_v17, %v2053_v27 }
  0x77   :  { %3699 = vst [vmem:[#allocation20_spill] sm:$0xff] %v3698_v12  ;;  %vm532_vm12 = vmand %vm292_vm1, %vm420_vm6  ;;  %v3700_v12 = vmov 0  ;;  %vm513_vm1 = vcmp.lt.s32.totalorder %v2515_v7, %v1948_v8  ;;  %v2566_v3 = vsub.f32 %v634_v15, %v916_v2 }
  0x78   :  { %vm2531_vm3 = vmpackc.low %vm532_vm12, %vm525_vm7  ;;  %vm392_vm7 = vcmp.ge.s32.totalorder %v2515_v7, %v1940_v6  ;;  %vm520_vm12 = vcmp.lt.s32.totalorder %v2515_v7, %v1951_v9 }
  0x79   :  { %v3701_v12 = vsel %vm2531_vm3, 4294967295, %v3700_v12  ;;  %1501 = vmatpush.bf16.msk.msra.mxu3 %vm2531_vm3, %v3696_v43  ;;  %vm624_vm15 = vmand %vm384_vm8, %vm512_vm0 }
  0x7a   :  { %3702 = vst [vmem:[#allocation21_spill] sm:$0xff] %v3701_v12  ;;  %vm631_vm6 = vmand %vm391_vm11, %vm519_vm13  ;;  %v3703_v12 = vmov 0  ;;  %vm386_vm11 = vcmp.ge.s32.totalorder %v2536_v1, %v1938_v5  ;;  %vm514_vm13 = vcmp.lt.s32.totalorder %v2536_v1, %v1948_v8  ;;  %v2581_v5 = vpack.c.bf16 %v2566_v3, %v2566_v3 }
  0x7b   :  { %vm2555_vm8 = vmpackc.low %vm631_vm6, %vm624_vm15  ;;  %vm393_vm15 = vcmp.ge.s32.totalorder %v2536_v1, %v1940_v6  ;;  %vm521_vm6 = vcmp.lt.s32.totalorder %v2536_v1, %v1951_v9  ;;  %v3707_v6 = vmov 0  ;;  %v3709_v8 = vmov 0 }
  0x7c   :  { %v3704_v12 = vsel %vm2555_vm8, 4294967295, %v3703_v12  ;;  %1503 = vmatpush.bf16.msk.msrb.mxu0 %vm2555_vm8, %v3696_v43  ;;  %vm625_vm0 = vmand %vm385_vm5, %vm513_vm1  ;;  %vm370_vm1 = vcmp.ge.s32.totalorder %v2497_v17, %v1972_v13  ;;  %969 = vmatmul.bf16.vlgmr.msra.gmra.mxu3 %v2581_v5  ;;  %v3711_v9 = vmov 0 }
  0x7d   :  { %1551 = vmatpush.bf16.msk.msrb.mxu3 %vm1974_vm10, %v3696_v43  ;;  %vm632_vm10 = vmand %vm392_vm7, %vm520_vm12  ;;  %vm377_vm12 = vcmp.ge.s32.totalorder %v2497_v17, %v1981_v16  ;;  %930 = vmatmul.bf16.vlgmr.msra.gmra.mxu0 %v2581_v5 }
  0x7e   :  { %vm2572_vm3 = vmpackc.low %vm632_vm10, %vm625_vm0  ;;  %vm498_vm10 = vcmp.lt.s32.totalorder %v2497_v17, %v1999_v19  ;;  %vm505_vm0 = vcmp.lt.s32.totalorder %v2497_v17, %v2009_v20  ;;  %943 = vmatmul.bf16.vlgmr.msra.gmra.mxu1 %v2581_v5  ;;  %956 = vmatmul.bf16.vlgmr.msra.gmra.mxu2 %v2581_v5 }
  0x7f   :  { %v3706_v14 = vsel %vm2572_vm3, 4294967295, %v3705_v14  ;;  %1519 = vmatpush.bf16.msk.msrb.mxu1 %vm2572_vm3, %v3696_v43  ;;  %vm626_vm5 = vmand %vm386_vm11, %vm514_vm13  ;;  %vm371_vm13 = vcmp.ge.s32.totalorder %v2515_v7, %v1972_v13 }
  0x80   :  { %vm633_vm7 = vmand %vm393_vm15, %vm521_vm6  ;;  %vm499_vm15 = vcmp.lt.s32.totalorder %v2515_v7, %v1999_v19 }
  0x81   :  { %1553 = vmatpush.bf16.msk.msrb.mxu3 %vm2049_vm9, %v3696_v43  ;;  %vm2595_vm9 = vmpackc.low %vm633_vm7, %vm626_vm5  ;;  %vm378_vm5 = vcmp.ge.s32.totalorder %v2515_v7, %v1981_v16  ;;  %vm506_vm7 = vcmp.lt.s32.totalorder %v2515_v7, %v2009_v20 }
  0x82   :  { %v3708_v6 = vsel %vm2595_vm9, 4294967295, %v3707_v6  ;;  %1535 = vmatpush.bf16.msk.msrb.mxu2 %vm2595_vm9, %v3696_v43  ;;  %vm610_vm11 = vmand %vm370_vm1, %vm498_vm10  ;;  %vm379_vm9 = vcmp.ge.s32.totalorder %v2536_v1, %v1981_v16  ;;  %v3716_v16 = vmov 0 }
  0x83   :  { %vm617_vm6 = vmand %vm377_vm12, %vm505_vm0  ;;  %vm372_vm12 = vcmp.ge.s32.totalorder %v2536_v1, %v1972_v13  ;;  %vm500_vm0 = vcmp.lt.s32.totalorder %v2536_v1, %v1999_v19  ;;  %v3713_v13 = vmov 0  ;;  %v3719_v19 = vmov 0 }
  0x84   :  { %vm2616_vm1 = vmpackc.low %vm617_vm6, %vm610_vm11  ;;  %vm507_vm11 = vcmp.lt.s32.totalorder %v2536_v1, %v2009_v20 }
  0x85   :  { %1555 = vmatpush.bf16.msk.msrb.mxu3 %vm2121_vm2, %v3696_v43  ;;  %v3710_v8 = vsel %vm2616_vm1, 4294967295, %v3709_v8  ;;  %1505 = vmatpush.bf16.msk.msrb.mxu0 %vm2616_vm1, %v3696_v43  ;;  %vm611_vm10 = vmand %vm371_vm13, %vm499_vm15  ;;  %vm356_vm15 = vcmp.ge.s32.totalorder %v2497_v17, %v2047_v25 }
  0x86   :  { %vm618_vm2 = vmand %vm378_vm5, %vm506_vm7  ;;  %vm484_vm5 = vcmp.lt.s32.totalorder %v2497_v17, %v2071_v29 }
  0x87   :  { %vm2634_vm6 = vmpackc.low %vm618_vm2, %vm611_vm10  ;;  %vm491_vm2 = vcmp.lt.s32.totalorder %v2497_v17, %v2081_v30 }
  0x88   :  { %v3712_v9 = vsel %vm2634_vm6, 4294967295, %v3711_v9  ;;  %1521 = vmatpush.bf16.msk.msrb.mxu1 %vm2634_vm6, %v3696_v43  ;;  %vm612_vm13 = vmand %vm372_vm12, %vm500_vm0  ;;  %vm3715_vm12 = vnez %v3662_v56 }
  0x89   :  { %1557 = vmatpush.bf16.msk.msrb.mxu3 %vm2193_vm14, %v3696_v43  ;;  %vm619_vm7 = vmand %vm379_vm9, %vm507_vm11  ;;  %vm357_vm9 = vcmp.ge.s32.totalorder %v2515_v7, %v2047_v25  ;;  %vm485_vm11 = vcmp.lt.s32.totalorder %v2515_v7, %v2071_v29 }
  0x8a   :  { %vm2649_vm10 = vmpackc.low %vm619_vm7, %vm612_vm13  ;;  %vm364_vm13 = vcmp.ge.s32.totalorder %v2515_v7, %v2053_v27  ;;  %vm492_vm7 = vcmp.lt.s32.totalorder %v2515_v7, %v2081_v30 }
  0x8b   :  { %v3714_v13 = vsel %vm2649_vm10, 4294967295, %v3713_v13  ;;  %1537 = vmatpush.bf16.msk.msrb.mxu2 %vm2649_vm10, %v3696_v43  ;;  %vm596_vm0 = vmand %vm356_vm15, %vm484_vm5  ;;  %vm358_vm5 = vcmp.ge.s32.totalorder %v2536_v1, %v2047_v25  ;;  %v3724_v25 = vmov 0 }
  0x8c   :  { %vm603_vm14 = vmand %vm363_vm4, %vm491_vm2  ;;  %vm486_vm4 = vcmp.lt.s32.totalorder %v2536_v1, %v2071_v29  ;;  %vm3718_vm2 = vnez %v3671_v10 }
  0x8d   :  { %1559 = vmatpush.bf16.msk.msrb.mxu3 %vm3715_vm12, %v3696_v43  ;;  %vm2667_vm6 = vmpackc.low %vm603_vm14, %vm596_vm0  ;;  %vm365_vm14 = vcmp.ge.s32.totalorder %v2536_v1, %v2053_v27  ;;  %vm493_vm0 = vcmp.lt.s32.totalorder %v2536_v1, %v2081_v30  ;;  %v3727_v27 = vmov 0  ;;  %v3731_v30 = vmov 0 }
  0x8e   :  { %v3717_v16 = vsel %vm2667_vm6, 4294967295, %v3716_v16  ;;  %1507 = vmatpush.bf16.msk.msrb.mxu0 %vm2667_vm6, %v3696_v43  ;;  %vm597_vm15 = vmand %vm357_vm9, %vm485_vm11  ;;  %vm342_vm11 = vcmp.ge.s32.totalorder %v2497_v17, %v2119_v35 }
  0x8f   :  { %vm604_vm12 = vmand %vm364_vm13, %vm492_vm7  ;;  %vm470_vm13 = vcmp.lt.s32.totalorder %v2497_v17, %v2143_v39 }
  0x90   :  { %vm2685_vm10 = vmpackc.low %vm604_vm12, %vm597_vm15  ;;  %vm477_vm12 = vcmp.lt.s32.totalorder %v2497_v17, %v2153_v40  ;;  %vm3721_vm15 = vnez %v3681_v53 }
  0x91   :  { %1561 = vmatpush.bf16.msk.msrb.mxu3 %vm3718_vm2, %v3696_v43  ;;  %v3720_v19 = vsel %vm2685_vm10, 4294967295, %v3719_v19  ;;  %1523 = vmatpush.bf16.msk.msrb.mxu1 %vm2685_vm10, %v3696_v43  ;;  %vm598_vm9 = vmand %vm358_vm5, %vm486_vm4  ;;  %vm349_vm2 = vcmp.ge.s32.totalorder %v2497_v17, %v2125_v37  ;;  %vm343_vm4 = vcmp.ge.s32.totalorder %v2515_v7, %v2119_v35  ;;  %vm350_vm10 = vcmp.ge.s32.totalorder %v2515_v7, %v2125_v37 }
  0x92   :  { %vm605_vm7 = vmand %vm365_vm14, %vm493_vm0  ;;  %vm471_vm14 = vcmp.lt.s32.totalorder %v2515_v7, %v2143_v39 }
  0x93   :  { %vm2703_vm3 = vmpackc.low %vm605_vm7, %vm598_vm9  ;;  %vm478_vm9 = vcmp.lt.s32.totalorder %v2515_v7, %v2153_v40 }
  0x94   :  { %1539 = vmatpush.bf16.msk.msrb.mxu2 %vm2703_vm3, %v3696_v43  ;;  %vm582_vm5 = vmand %vm342_vm11, %vm470_vm13  ;;  %vm3726_vm11 = vnez %v3692_v0 }
  0x95   :  { %1563 = vmatpush.bf16.msk.msrb.mxu3 %vm3721_vm15, %v3696_v43  ;;  %vm589_vm0 = vmand %vm349_vm2, %vm477_vm12  ;;  %vm344_vm2 = vcmp.ge.s32.totalorder %v2536_v1, %v2119_v35  ;;  %vm472_vm12 = vcmp.lt.s32.totalorder %v2536_v1, %v2143_v39  ;;  %v3737_v39 = vmov 0 }
  0x96   :  { %vm2718_vm7 = vmpackc.low %vm589_vm0, %vm582_vm5  ;;  %vm351_vm0 = vcmp.ge.s32.totalorder %v2536_v1, %v2125_v37  ;;  %v3735_v37 = vmov 0 }
  0x97   :  { %v3725_v25 = vsel %vm2718_vm7, 4294967295, %v3724_v25  ;;  %1509 = vmatpush.bf16.msk.msrb.mxu0 %vm2718_vm7, %v3696_v43  ;;  %vm583_vm13 = vmand %vm343_vm4, %vm471_vm14  ;;  %vm456_vm14 = vcmp.lt.s32.totalorder %v2497_v17, %v2215_v49 }
  0x98   :  { %vm590_vm5 = vmand %vm350_vm10, %vm478_vm9  ;;  %vm328_vm10 = vcmp.ge.s32.totalorder %v2497_v17, %v2191_v45 }
  0x99   :  { %1565 = vmatpush.bf16.msk.msrb.mxu3 %vm3726_vm11, %v3696_v43  ;;  %vm479_vm11 = vcmp.lt.s32.totalorder %v2536_v1, %v2153_v40  ;;  %vm2739_vm15 = vmpackc.low %vm590_vm5, %vm583_vm13  ;;  %vm335_vm13 = vcmp.ge.s32.totalorder %v2497_v17, %v2197_v47  ;;  %vm463_vm5 = vcmp.lt.s32.totalorder %v2497_v17, %v2225_v50 }
  0x9a   :  { %v3728_v27 = vsel %vm2739_vm15, 4294967295, %v3727_v27  ;;  %1525 = vmatpush.bf16.msk.msrb.mxu1 %vm2739_vm15, %v3696_v43  ;;  %vm584_vm4 = vmand %vm344_vm2, %vm472_vm12  ;;  %vm457_vm12 = vcmp.lt.s32.totalorder %v2515_v7, %v2215_v49  ;;  %vm336_vm15 = vcmp.ge.s32.totalorder %v2515_v7, %v2197_v47 }
  0x9b   :  { %vm591_vm9 = vmand %vm351_vm0, %vm479_vm11  ;;  %vm329_vm11 = vcmp.ge.s32.totalorder %v2515_v7, %v2191_v45 }
  0x9c   :  { %1021 = vmatmul.bf16.vlgmr.msrb.gmra.mxu3 %v2538_v33  ;;  %vm568_vm2 = vmand %vm328_vm10, %vm456_vm14  ;;  %vm330_vm14 = vcmp.ge.s32.totalorder %v2536_v1, %v2191_v45  ;;  %v3741_v45 = vmov 0 }
  0x9d   :  { %1615 = vmatpush.bf16.msk.msra.mxu3 %vm2555_vm8, %v3696_v43  ;;  %vm2758_vm8 = vmpackc.low %vm591_vm9, %vm584_vm4  ;;  %vm464_vm4 = vcmp.lt.s32.totalorder %v2515_v7, %v2225_v50 }
  0x9e   :  { %1541 = vmatpush.bf16.msk.msrb.mxu2 %vm2758_vm8, %v3696_v43  ;;  %vm575_vm0 = vmand %vm335_vm13, %vm463_vm5  ;;  %vm458_vm13 = vcmp.lt.s32.totalorder %v2536_v1, %v2215_v49  ;;  %v3745_v49 = vmov 0 }
  0x9f   :  { %vm2773_vm9 = vmpackc.low %vm575_vm0, %vm568_vm2  ;;  %vm337_vm2 = vcmp.ge.s32.totalorder %v2536_v1, %v2197_v47  ;;  %vm465_vm0 = vcmp.lt.s32.totalorder %v2536_v1, %v2225_v50  ;;  %v3743_v47 = vmov 0  ;;  %v3747_v50 = vmov 0 }
  0xa0   :  { %v3732_v30 = vsel %vm2773_vm9, 4294967295, %v3731_v30  ;;  %1511 = vmatpush.bf16.msk.msrb.mxu0 %vm2773_vm9, %v3696_v43  ;;  %vm569_vm10 = vmand %vm329_vm11, %vm457_vm12  ;;  %vm314_vm12 = vcmp.ge.s32.totalorder %v2497_v17, %v2263_v55 }
  0xa1   :  { %1617 = vmatpush.bf16.msk.msra.mxu3 %vm2616_vm1, %v3696_v43  ;;  %vm576_vm5 = vmand %vm336_vm15, %vm464_vm4  ;;  %vm442_vm15 = vcmp.lt.s32.totalorder %v2497_v17, %v2287_v59 }
  0xa2   :  { %vm2791_vm1 = vmpackc.low %vm576_vm5, %vm569_vm10  ;;  %vm321_vm10 = vcmp.ge.s32.totalorder %v2497_v17, %v2269_v57  ;;  %vm449_vm5 = vcmp.lt.s32.totalorder %v2497_v17, %v2297_v60 }
  0xa3   :  { %1527 = vmatpush.bf16.msk.msrb.mxu1 %vm2791_vm1, %v3696_v43  ;;  %vm570_vm11 = vmand %vm330_vm14, %vm458_vm13  ;;  %vm315_vm13 = vcmp.ge.s32.totalorder %v2515_v7, %v2263_v55 }
  0xa4   :  { %vm577_vm4 = vmand %vm337_vm2, %vm465_vm0  ;;  %vm443_vm2 = vcmp.lt.s32.totalorder %v2515_v7, %v2287_v59 }
  0xa5   :  { %1619 = vmatpush.bf16.msk.msra.mxu3 %vm2667_vm6, %v3696_v43  ;;  %vm2809_vm6 = vmpackc.low %vm577_vm4, %vm570_vm11  ;;  %vm450_vm11 = vcmp.lt.s32.totalorder %v2515_v7, %v2297_v60 }
  0xa6   :  { %v3736_v37 = vsel %vm2809_vm6, 4294967295, %v3735_v37  ;;  %1543 = vmatpush.bf16.msk.msrb.mxu2 %vm2809_vm6, %v3696_v43  ;;  %vm554_vm14 = vmand %vm314_vm12, %vm442_vm15  ;;  %vm316_vm15 = vcmp.ge.s32.totalorder %v2536_v1, %v2263_v55  ;;  %vm323_vm6 = vcmp.ge.s32.totalorder %v2536_v1, %v2269_v57 }
  0xa7   :  { %vm561_vm0 = vmand %vm321_vm10, %vm449_vm5  ;;  %vm444_vm10 = vcmp.lt.s32.totalorder %v2536_v1, %v2287_v59  ;;  %v3780_v59 = vld [vmem:[#allocation19_spill] sm:$0xff] }
  0xa8   :  { %vm2827_vm4 = vmpackc.low %vm561_vm0, %vm554_vm14  ;;  %vm451_vm14 = vcmp.lt.s32.totalorder %v2536_v1, %v2297_v60  ;;  %v919_v60 = vunpack.c.l.bf16 %v2581_v5 }
  0xa9   :  { %1621 = vmatpush.bf16.msk.msra.mxu3 %vm2718_vm7, %v3696_v43  ;;  %vm322_vm7 = vcmp.ge.s32.totalorder %v2515_v7, %v2269_v57  ;;  %v3738_v39 = vsel %vm2827_vm4, 4294967295, %v3737_v39  ;;  %1513 = vmatpush.bf16.msk.msrb.mxu0 %vm2827_vm4, %v3696_v43  ;;  %vm555_vm12 = vmand %vm315_vm13, %vm443_vm2  ;;  %vm428_vm2 = vcmp.lt.s32.totalorder %v2497_v17, %v2359_v23  ;;  %v3776_v57 = vld [vmem:[#allocation15_spill] sm:$0xff] }
  0xaa   :  { %vm562_vm5 = vmand %vm322_vm7, %vm450_vm11  ;;  %vm300_vm7 = vcmp.ge.s32.totalorder %v2497_v17, %v2335_v4 }
  0xab   :  { %vm2842_vm0 = vmpackc.low %vm562_vm5, %vm555_vm12  ;;  %vm307_vm12 = vcmp.ge.s32.totalorder %v2497_v17, %v2341_v11  ;;  %vm435_vm5 = vcmp.lt.s32.totalorder %v2497_v17, %v2369_v32 }
  0xac   :  { %1529 = vmatpush.bf16.msk.msrb.mxu1 %vm2842_vm0, %v3696_v43  ;;  %vm556_vm13 = vmand %vm316_vm15, %vm444_vm10  ;;  %vm301_vm10 = vcmp.ge.s32.totalorder %v2515_v7, %v2335_v4 }
  0xad   :  { %1623 = vmatpush.bf16.msk.msra.mxu3 %vm2773_vm9, %v3696_v43  ;;  %vm563_vm11 = vmand %vm323_vm6, %vm451_vm14  ;;  %vm429_vm6 = vcmp.lt.s32.totalorder %v2515_v7, %v2359_v23 }
  0xae   :  { %vm2860_vm9 = vmpackc.low %vm563_vm11, %vm556_vm13  ;;  %vm436_vm13 = vcmp.lt.s32.totalorder %v2515_v7, %v2369_v32 }
  0xaf   :  { %v3742_v45 = vsel %vm2860_vm9, 4294967295, %v3741_v45  ;;  %1545 = vmatpush.bf16.msk.msrb.mxu2 %vm2860_vm9, %v3696_v43  ;;  %vm540_vm15 = vmand %vm300_vm7, %vm428_vm2  ;;  %vm302_vm2 = vcmp.ge.s32.totalorder %v2536_v1, %v2335_v4  ;;  %v3783_v4 = vld [vmem:[#allocation18_spill] sm:$0xff] }
  0xb0   :  { %vm547_vm14 = vmand %vm307_vm12, %vm435_vm5  ;;  %vm430_vm12 = vcmp.lt.s32.totalorder %v2536_v1, %v2359_v23 }
  0xb1   :  { %1625 = vmatpush.bf16.msk.msra.mxu3 %vm2827_vm4, %v3696_v43  ;;  %vm308_vm4 = vcmp.ge.s32.totalorder %v2515_v7, %v2341_v11  ;;  %vm2875_vm11 = vmpackc.low %vm547_vm14, %vm540_vm15  ;;  %vm309_vm15 = vcmp.ge.s32.totalorder %v2536_v1, %v2341_v11  ;;  %vm437_vm14 = vcmp.lt.s32.totalorder %v2536_v1, %v2369_v32  ;;  %v920_v11 = vsub.f32 %v2566_v3, %v919_v60  ;;  %v3791_v3 = vld [vmem:[#allocation12_spill] sm:$0xff] }
  0xb2   :  { %v3744_v47 = vsel %vm2875_vm11, 4294967295, %v3743_v47  ;;  %1515 = vmatpush.bf16.msk.msrb.mxu0 %vm2875_vm11, %v3696_v43  ;;  %vm541_vm7 = vmand %vm301_vm10, %vm429_vm6  ;;  %vm286_vm6 = vcmp.ge.s32.totalorder %v2497_v17, %v2407_v52 }
  0xb3   :  { %vm548_vm5 = vmand %vm308_vm4, %vm436_vm13  ;;  %vm414_vm4 = vcmp.lt.s32.totalorder %v2497_v17, %v2431_v63  ;;  %v3064_v23 = vpack.c.bf16 %v920_v11, %v920_v11 }
  0xb4   :  { %vm2893_vm9 = vmpackc.low %vm548_vm5, %vm541_vm7  ;;  %vm421_vm7 = vcmp.lt.s32.totalorder %v2497_v17, %v2441_v42 }
  0xb5   :  { %1627 = vmatpush.bf16.msk.msra.mxu3 %vm2875_vm11, %v3696_v43  ;;  %v3746_v49 = vsel %vm2893_vm9, 4294967295, %v3745_v49  ;;  %1531 = vmatpush.bf16.msk.msrb.mxu1 %vm2893_vm9, %v3696_v43  ;;  %vm542_vm10 = vmand %vm302_vm2, %vm430_vm12  ;;  %vm293_vm11 = vcmp.ge.s32.totalorder %v2497_v17, %v2413_v62  ;;  %vm287_vm12 = vcmp.ge.s32.totalorder %v2515_v7, %v2407_v52  ;;  %vm294_vm9 = vcmp.ge.s32.totalorder %v2515_v7, %v2413_v62 }
  0xb6   :  { %vm549_vm13 = vmand %vm309_vm15, %vm437_vm14  ;;  %vm415_vm15 = vcmp.lt.s32.totalorder %v2515_v7, %v2431_v63  ;;  %v3749_v17 = vmov 0 }
  0xb7   :  { %vm2908_vm5 = vmpackc.low %vm549_vm13, %vm542_vm10  ;;  %vm422_vm10 = vcmp.lt.s32.totalorder %v2515_v7, %v2441_v42 }
  0xb8   :  { %v3748_v50 = vsel %vm2908_vm5, 4294967295, %v3747_v50  ;;  %1547 = vmatpush.bf16.msk.msrb.mxu2 %vm2908_vm5, %v3696_v43  ;;  %vm526_vm2 = vmand %vm286_vm6, %vm414_vm4  ;;  %vm288_vm4 = vcmp.ge.s32.totalorder %v2536_v1, %v2407_v52 }
  0xb9   :  { %vm533_vm14 = vmand %vm293_vm11, %vm421_vm7  ;;  %vm416_vm11 = vcmp.lt.s32.totalorder %v2536_v1, %v2431_v63 }
  0xba   :  { %vm2923_vm13 = vmpackc.low %vm533_vm14, %vm526_vm2  ;;  %vm295_vm2 = vcmp.ge.s32.totalorder %v2536_v1, %v2413_v62  ;;  %vm423_vm14 = vcmp.lt.s32.totalorder %v2536_v1, %v2441_v42 }
  0xbb   :  { %v3750_v17 = vsel %vm2923_vm13, 4294967295, %v3749_v17  ;;  %1517 = vmatpush.bf16.msk.msrb.mxu0 %vm2923_vm13, %v3696_v43  ;;  %vm527_vm6 = vmand %vm287_vm12, %vm415_vm15  ;;  %1629 = vmatpush.bf16.msk.msra.mxu3 %vm2923_vm13, %v3696_v43  ;;  %vm3751_vm12 = vnez %v3632_v18  ;;  %vm3754_vm13 = vnez %v3634_v21 }
  0xbc   :  { %vm534_vm7 = vmand %vm294_vm9, %vm422_vm10 }
  0xbd   :  { %vm2947_vm15 = vmpackc.low %vm534_vm7, %vm527_vm6  ;;  %vm3757_vm6 = vnez %v3640_v28  ;;  %vm3760_vm7 = vnez %v3648_v38  ;;  %v3770_v28 = vld [vmem:[#allocation13_spill] sm:$0xff]  ;;  %v3772_v38 = vld [vmem:[#allocation14_spill] sm:$0xff] }
  0xbe   :  { %1533 = vmatpush.bf16.msk.msrb.mxu1 %vm2947_vm15, %v3696_v43  ;;  %vm528_vm9 = vmand %vm288_vm4, %vm416_vm11  ;;  %982 = vmatmul.bf16.vlgmr.msrb.gmra.mxu0 %v2581_v5  ;;  %vm3758_vm4 = vnez %v3636_v24  ;;  %vm3759_vm11 = vnez %v3642_v31 }
  0xbf   :  { %1567 = vmatpush.bf16.msk.msra.mxu0 %vm3751_vm12, %v3696_v43  ;;  %1679 = vmatpush.bf16.msk.msrb.mxu3 %vm3751_vm12, %v3696_v43  ;;  %vm535_vm10 = vmand %vm295_vm2, %vm423_vm14  ;;  %vm3761_vm2 = vnez %v3644_v34  ;;  %vm3762_vm14 = vnez %v3650_v41  ;;  %vm3763_vm12 = vnez %v3656_v48  ;;  %v3774_v48 = vld [vmem:[#allocation16_spill] sm:$0xff] }
  0xc0   :  { %1073 = vmatmul.bf16.vlgmr.msra.gmra.mxu3 %v2538_v33  ;;  %vm2959_vm5 = vmpackc.low %vm535_vm10, %vm528_vm9  ;;  %vm3764_vm9 = vnez %v3652_v44  ;;  %vm3765_vm10 = vnez %v3658_v51 }
  0xc1   :  { %1549 = vmatpush.bf16.msk.msrb.mxu2 %vm2959_vm5, %v3696_v43  ;;  %995 = vmatmul.bf16.vlgmr.msrb.gmra.mxu1 %v2581_v5 }
  0xc2   :  { %1583 = vmatpush.bf16.msk.msra.mxu1 %vm3754_vm13, %v3696_v43 }
  0xc3   :  { %1569 = vmatpush.bf16.msk.msra.mxu0 %vm3757_vm6, %v3696_v43  ;;  %1681 = vmatpush.bf16.msk.msrb.mxu3 %vm3757_vm6, %v3696_v43  ;;  %vm3766_vm6 = vnez %v3664_v58  ;;  %v3778_v58 = vld [vmem:[#allocation17_spill] sm:$0xff] }
  0xc4   :  { %1008 = vmatmul.bf16.vlgmr.msrb.gmra.mxu2 %v2581_v5 }
  0xc5   :  { %1599 = vmatpush.bf16.msk.msra.mxu2 %vm3758_vm4, %v3696_v43 }
  0xc6   :  { %1585 = vmatpush.bf16.msk.msra.mxu1 %vm3759_vm11, %v3696_v43 }
  0xc7   :  { %1571 = vmatpush.bf16.msk.msra.mxu0 %vm3760_vm7, %v3696_v43  ;;  %1683 = vmatpush.bf16.msk.msrb.mxu3 %vm3760_vm7, %v3696_v43  ;;  %vm3767_vm7 = vnez %v3660_v54 }
  0xc9   :  { %1601 = vmatpush.bf16.msk.msra.mxu2 %vm3761_vm2, %v3696_v43 }
  0xca   :  { %1587 = vmatpush.bf16.msk.msra.mxu1 %vm3762_vm14, %v3696_v43 }
  0xcb   :  { %1573 = vmatpush.bf16.msk.msra.mxu0 %vm3763_vm12, %v3696_v43  ;;  %1685 = vmatpush.bf16.msk.msrb.mxu3 %vm3763_vm12, %v3696_v43  ;;  %vm3768_vm12 = vnez %v3666_v61 }
  0xcd   :  { %1603 = vmatpush.bf16.msk.msra.mxu2 %vm3764_vm9, %v3696_v43  ;;  %vm3769_vm9 = vnez %v3673_v22  ;;  %v3785_v22 = vld [vmem:[#allocation20_spill] sm:$0xff] }
  0xce   :  { %1589 = vmatpush.bf16.msk.msra.mxu1 %vm3765_vm10, %v3696_v43  ;;  %vm3771_vm10 = vnez %v3770_v28 }
  0xcf   :  { %1575 = vmatpush.bf16.msk.msra.mxu0 %vm3766_vm6, %v3696_v43  ;;  %1687 = vmatpush.bf16.msk.msrb.mxu3 %vm3766_vm6, %v3696_v43  ;;  %vm3773_vm6 = vnez %v3772_v38 }
  0xd1   :  { %1605 = vmatpush.bf16.msk.msra.mxu2 %vm3767_vm7, %v3696_v43  ;;  %vm3775_vm7 = vnez %v3774_v48 }
  0xd2   :  { %1591 = vmatpush.bf16.msk.msra.mxu1 %vm3768_vm12, %v3696_v43  ;;  %vm3777_vm12 = vnez %v3776_v57 }
  0xd3   :  { %1577 = vmatpush.bf16.msk.msra.mxu0 %vm3769_vm9, %v3696_v43  ;;  %1689 = vmatpush.bf16.msk.msrb.mxu3 %vm3769_vm9, %v3696_v43  ;;  %vm3779_vm9 = vnez %v3778_v58 }
  0xd5   :  { %1607 = vmatpush.bf16.msk.msra.mxu2 %vm3771_vm10, %v3696_v43  ;;  %vm3781_vm10 = vnez %v3780_v59 }
  0xd6   :  { %1593 = vmatpush.bf16.msk.msra.mxu1 %vm3773_vm6, %v3696_v43  ;;  %vm3782_vm6 = vnez %v3706_v14  ;;  %v3789_v14 = vld [vmem:[#allocation21_spill] sm:$0xff] }
  0xd7   :  { %1579 = vmatpush.bf16.msk.msra.mxu0 %vm3775_vm7, %v3696_v43  ;;  %1691 = vmatpush.bf16.msk.msrb.mxu3 %vm3775_vm7, %v3696_v43  ;;  %vm3784_vm7 = vnez %v3783_v4 }
  0xd9   :  { %1609 = vmatpush.bf16.msk.msra.mxu2 %vm3777_vm12, %v3696_v43  ;;  %vm3787_vm12 = vnez %v3708_v6 }
  0xda   :  { %1595 = vmatpush.bf16.msk.msra.mxu1 %vm3779_vm9, %v3696_v43  ;;  %vm3786_vm9 = vnez %v3785_v22 }
  0xdb   :  { %1581 = vmatpush.bf16.msk.msra.mxu0 %vm3781_vm10, %v3696_v43  ;;  %1693 = vmatpush.bf16.msk.msrb.mxu3 %vm3781_vm10, %v3696_v43  ;;  %vm3788_vm10 = vnez %v3712_v9 }
  0xdd   :  { %1611 = vmatpush.bf16.msk.msra.mxu2 %vm3784_vm7, %v3696_v43  ;;  %vm3795_vm7 = vnez %v3638_v26 }
  0xde   :  { %1597 = vmatpush.bf16.msk.msra.mxu1 %vm3786_vm9, %v3696_v43  ;;  %1034 = vmatmul.bf16.vlgmr.msra.gmra.mxu0 %v2538_v33  ;;  %vm3792_vm9 = vnez %v3791_v3 }
  0xdf   :  { %1631 = vmatpush.bf16.msk.msrb.mxu0 %vm3782_vm6, %v3696_v43  ;;  %1743 = vmatpush.bf16.msk.msra.mxu3 %vm3782_vm6, %v3696_v43  ;;  %vm3790_vm6 = vnez %v3789_v14 }
  0xe0   :  { %1125 = vmatmul.bf16.vlgmr.msrb.gmra.mxu3 %v3064_v23 }
  0xe1   :  { %1613 = vmatpush.bf16.msk.msra.mxu2 %vm3790_vm6, %v3696_v43  ;;  %1047 = vmatmul.bf16.vlgmr.msra.gmra.mxu1 %v2538_v33  ;;  %vm3794_vm6 = vnez %v3720_v19 }
  0xe2   :  { %1647 = vmatpush.bf16.msk.msrb.mxu1 %vm3787_vm12, %v3696_v43  ;;  %vm3793_vm12 = vnez %v3714_v13  ;;  %v87_v13 = vld [vmem:[#allocation7] sm:$0xff] }
  0xe3   :  { %1633 = vmatpush.bf16.msk.msrb.mxu0 %vm3788_vm10, %v3696_v43  ;;  %1745 = vmatpush.bf16.msk.msra.mxu3 %vm3788_vm10, %v3696_v43  ;;  %vm3797_vm10 = vnez %v3646_v36  ;;  %v90_v20 = vperm.slane %v87_v13, 1  ;;  %v93_v29 = vperm.slane %v87_v13, 4 }
  0xe4   :  { %1060 = vmatmul.bf16.vlgmr.msra.gmra.mxu2 %v2538_v33 }
  0xe5   :  { %1663 = vmatpush.bf16.msk.msrb.mxu2 %vm3792_vm9, %v3696_v43  ;;  %vm3796_vm9 = vnez %v3728_v27  ;;  %v92_v27 = vperm.slane %v87_v13, 3 }
  0xe6   :  { %1649 = vmatpush.bf16.msk.msrb.mxu1 %vm3793_vm12, %v3696_v43 }
  0xe7   :  { %1635 = vmatpush.bf16.msk.msrb.mxu0 %vm3794_vm6, %v3696_v43  ;;  %1747 = vmatpush.bf16.msk.msra.mxu3 %vm3794_vm6, %v3696_v43  ;;  %vm3799_vm6 = vnez %v3736_v37  ;;  %v98_v18 = vrot.slane %v92_v27, 5 }
  0xe9   :  { %1665 = vmatpush.bf16.msk.msrb.mxu2 %vm3795_vm7, %v3696_v43  ;;  %vm3798_vm7 = vnez %v3654_v46 }
  0xea   :  { %1651 = vmatpush.bf16.msk.msrb.mxu1 %vm2703_vm3, %v3696_v43 }
  0xeb   :  { %1637 = vmatpush.bf16.msk.msrb.mxu0 %vm3796_vm9, %v3696_v43  ;;  %1749 = vmatpush.bf16.msk.msra.mxu3 %vm3796_vm9, %v3696_v43  ;;  %vm3800_vm9 = vnez %v3662_v56 }
  0xed   :  { %1667 = vmatpush.bf16.msk.msrb.mxu2 %vm3797_vm10, %v3696_v43  ;;  %vm3801_vm10 = vnez %v3742_v45 }
  0xee   :  { %1653 = vmatpush.bf16.msk.msrb.mxu1 %vm2758_vm8, %v3696_v43 }
  0xef   :  { %1639 = vmatpush.bf16.msk.msrb.mxu0 %vm2791_vm1, %v3696_v43  ;;  %1751 = vmatpush.bf16.msk.msra.mxu3 %vm2791_vm1, %v3696_v43  ;;  %vm3803_vm1 = vnez %v3671_v10 }
  0xf1   :  { %1669 = vmatpush.bf16.msk.msrb.mxu2 %vm3798_vm7, %v3696_v43  ;;  %vm3802_vm7 = vnez %v3746_v49  ;;  %v89_v49 = vperm.slane %v87_v13, 0 }
  0xf2   :  { %1655 = vmatpush.bf16.msk.msrb.mxu1 %vm3799_vm6, %v3696_v43  ;;  %vm3804_vm6 = vnez %v3748_v50  ;;  %v95_v50 = vperm.slane %v87_v13, 6 }
  0xf3   :  { %1641 = vmatpush.bf16.msk.msrb.mxu0 %vm2842_vm0, %v3696_v43  ;;  %1753 = vmatpush.bf16.msk.msra.mxu3 %vm2842_vm0, %v3696_v43  ;;  %vm3805_vm0 = vnez %v3681_v53 }
  0xf5   :  { %1671 = vmatpush.bf16.msk.msrb.mxu2 %vm3800_vm9, %v3696_v43  ;;  %vm3807_vm9 = vnez %v3704_v12 }
  0xf6   :  { %1657 = vmatpush.bf16.msk.msrb.mxu1 %vm3801_vm10, %v3696_v43 }
  0xf7   :  { %1643 = vmatpush.bf16.msk.msrb.mxu0 %vm3802_vm7, %v3696_v43  ;;  %1755 = vmatpush.bf16.msk.msra.mxu3 %vm3802_vm7, %v3696_v43  ;;  %vm3812_vm7 = vnez %v3660_v54 }
  0xf9   :  { %1673 = vmatpush.bf16.msk.msrb.mxu2 %vm3803_vm1, %v3696_v43  ;;  %vm3814_vm1 = vnez %v3725_v25  ;;  %v91_v25 = vperm.slane %v87_v13, 2 }
  0xfa   :  { %1659 = vmatpush.bf16.msk.msrb.mxu1 %vm3804_vm6, %v3696_v43 }
  0xfb   :  { %1645 = vmatpush.bf16.msk.msrb.mxu0 %vm2947_vm15, %v3696_v43  ;;  %1757 = vmatpush.bf16.msk.msra.mxu3 %vm2947_vm15, %v3696_v43  ;;  %vm3808_vm15 = vnez %v3710_v8  ;;  %v944_v24 = vpop.f32.mrf.mxu1  ;;  %v97_v55 = vrot.slane %v91_v25, 6 }
  0xfd   :  { %1675 = vmatpush.bf16.msk.msrb.mxu2 %vm3805_vm0, %v3696_v43  ;;  %vm3815_vm0 = vnez %v3770_v28  ;;  %v99_v28 = vrot.slane %v93_v29, 4 }
  0xfe   :  { %1661 = vmatpush.bf16.msk.msrb.mxu1 %vm2959_vm5, %v3696_v43  ;;  %1086 = vmatmul.bf16.vlgmr.msrb.gmra.mxu0 %v2538_v33 }
  0xff   :  { %1695 = vmatpush.bf16.msk.msra.mxu0 %vm3754_vm13, %v3696_v43  ;;  %vm3806_vm13 = vnez %v3692_v0  ;;  %1177 = vmatmul.bf16.vlgmr.msra.gmra.mxu3 %v3064_v23  ;;  %v931_v0 = vpop.f32.mrf.mxu0  ;;  %v3217_v21 = vpop.f32.mrf.mxu3 }
 0x101   :  { %1677 = vmatpush.bf16.msk.msrb.mxu2 %vm3806_vm13, %v3696_v43  ;;  %1099 = vmatmul.bf16.vlgmr.msrb.gmra.mxu1 %v2538_v33  ;;  %vm3816_vm13 = vnez %v3772_v38  ;;  %v957_v26 = vpop.f32.mrf.mxu2 }
 0x102   :  { %1711 = vmatpush.bf16.msk.msra.mxu1 %vm3758_vm4, %v3696_v43  ;;  %vm3809_vm4 = vnez %v3652_v44 }
 0x103   :  { %1697 = vmatpush.bf16.msk.msra.mxu0 %vm3759_vm11, %v3696_v43  ;;  %vm3810_vm11 = vnez %v3658_v51  ;;  %v946_v36 = vpop.f32.mrf.mxu1 }
 0x104   :  { %1112 = vmatmul.bf16.vlgmr.msrb.gmra.mxu2 %v3064_v23 }
 0x105   :  { %1727 = vmatpush.bf16.msk.msra.mxu2 %vm3807_vm9, %v3696_v43  ;;  %vm3817_vm9 = vnez %v3732_v30  ;;  %v94_v30 = vperm.slane %v87_v13, 5 }
 0x106   :  { %1713 = vmatpush.bf16.msk.msra.mxu1 %vm3761_vm2, %v3696_v43  ;;  %vm3811_vm2 = vnez %v3717_v16 }
 0x107   :  { %1699 = vmatpush.bf16.msk.msra.mxu0 %vm3762_vm14, %v3696_v43  ;;  %vm3813_vm14 = vnez %v3666_v61  ;;  %v933_v31 = vpop.f32.mrf.mxu0  ;;  %v972_v34 = vpop.f32.mrf.mxu3  ;;  %v100_v38 = vrot.slane %v94_v30, 3  ;;  %v63_v30 = vld [vmem:[#allocation2] sm:$0xff] }
 0x109   :  { %1729 = vmatpush.bf16.msk.msra.mxu2 %vm3808_vm15, %v3696_v43  ;;  %vm3818_vm15 = vnez %v3776_v57  ;;  %v959_v41 = vpop.f32.mrf.mxu2 }
 0x10a   :  { %1715 = vmatpush.bf16.msk.msra.mxu1 %vm3809_vm4, %v3696_v43  ;;  %vm3819_vm4 = vnez %v3778_v58 }
 0x10b   :  { %1701 = vmatpush.bf16.msk.msra.mxu0 %vm3810_vm11, %v3696_v43  ;;  %vm3820_vm11 = vnez %v3738_v39 }
 0x10d   :  { %1731 = vmatpush.bf16.msk.msra.mxu2 %vm3811_vm2, %v3696_v43  ;;  %vm3821_vm2 = vnez %v3783_v4 }
 0x10e   :  { %1717 = vmatpush.bf16.msk.msra.mxu1 %vm3812_vm7, %v3696_v43  ;;  %vm3822_vm7 = vnez %v3785_v22 }
 0x10f   :  { %1703 = vmatpush.bf16.msk.msra.mxu0 %vm3813_vm14, %v3696_v43  ;;  %vm3823_vm14 = vnez %v3708_v6 }
 0x111   :  { %1733 = vmatpush.bf16.msk.msra.mxu2 %vm3814_vm1, %v3696_v43  ;;  %vm3824_vm1 = vnez %v3744_v47 }
 0x112   :  { %1719 = vmatpush.bf16.msk.msra.mxu1 %vm3815_vm0, %v3696_v43  ;;  %vm3825_vm0 = vnez %v3789_v14  ;;  %v101_v14 = vrot.slane %v95_v50, 2 }
 0x113   :  { %1705 = vmatpush.bf16.msk.msra.mxu0 %vm3816_vm13, %v3696_v43  ;;  %vm3826_vm13 = vnez %v3750_v17  ;;  %v96_v17 = vrot.slane %v90_v20, 7 }
 0x115   :  { %1735 = vmatpush.bf16.msk.msra.mxu2 %vm3817_vm9, %v3696_v43  ;;  %vm120_vm9 = vcmask 1045509  }
 0x116   :  { %1721 = vmatpush.bf16.msk.msra.mxu1 %vm3818_vm15, %v3696_v43  ;;  %vm131_vm15 = vcmask 1046534   ;;  %v121_v34 = vsel %vm120_vm9, %v99_v28, %v100_v38 }
 0x117   :  { %1707 = vmatpush.bf16.msk.msra.mxu0 %vm3819_vm4, %v3696_v43  ;;  %vm142_vm4 = vcmask 1046528  }
 0x118   :  { %v170_v25 = vsel %vm142_vm4, %v96_v17, %v89_v49 }
 0x119   :  { %1737 = vmatpush.bf16.msk.msra.mxu2 %vm3820_vm11, %v3696_v43  ;;  %vm3625_vm11 = vcmask 1041408  }
 0x11a   :  { %1723 = vmatpush.bf16.msk.msra.mxu1 %vm3821_vm2, %v3696_v43  ;;  %vm3621_vm2 = vcmask 1045508  }
 0x11b   :  { %1709 = vmatpush.bf16.msk.msra.mxu0 %vm3822_vm7, %v3696_v43  ;;  %vm3620_vm7 = vcmask 1042433  }
 0x11d   :  { %1739 = vmatpush.bf16.msk.msra.mxu2 %vm3824_vm1, %v3696_v43  ;;  %vm3627_vm1 = vcmask 1043458  }
 0x11e   :  { %1725 = vmatpush.bf16.msk.msra.mxu1 %vm3825_vm0, %v3696_v43  ;;  %1138 = vmatmul.bf16.vlgmr.msra.gmra.mxu0 %v3064_v23  ;;  %vm133_vm0 = vcmask 1045504  }
 0x11f   :  { %1759 = vmatpush.bf16.msk.msrb.mxu0 %vm3823_vm14, %v3696_v43  ;;  %v1022_v44 = vpop.f32.mrf.mxu3  ;;  %vm3623_vm14 = vcmask 1046533  }
 0x120   :  { %v1023_v46 = vadd.f32 %v1022_v44, %v931_v0 }
 0x121   :  { %1741 = vmatpush.bf16.msk.msra.mxu2 %vm3826_vm13, %v3696_v43  ;;  %1151 = vmatmul.bf16.vlgmr.msra.gmra.mxu1 %v3064_v23  ;;  %vm3626_vm13 = vcmask 1044483  }
 0x123   :  { %1761 = vmatpush.bf16.msk.msrb.mxu0 %vm3793_vm12, %v3696_v43  ;;  %vm3827_vm12 = vnez %v3736_v37 }
 0x124   :  { %1164 = vmatmul.bf16.vlgmr.msra.gmra.mxu2 %v3064_v23 }
 0x127   :  { %1763 = vmatpush.bf16.msk.msrb.mxu0 %vm2703_vm3, %v3696_v43  ;;  %v1024_v51 = vpop.f32.mrf.mxu3  ;;  %vm3622_vm3 = vcmask 1040384  }
 0x128   :  { %v103_v3 = vsel %vm3622_vm3, %v89_v49, %v96_v17  ;;  %v164_v13 = vsel %vm3622_vm3, %v97_v55, %v98_v18 }
 0x12b   :  { %1765 = vmatpush.bf16.msk.msrb.mxu0 %vm2758_vm8, %v3696_v43  ;;  %vm104_vm8 = vcmask 1042434  }
 0x12c   :  { %v127_v41 = vsel %vm104_vm8, %v89_v49, %v96_v17 }
 0x12f   :  { %1767 = vmatpush.bf16.msk.msrb.mxu0 %vm3827_vm12, %v3696_v43  ;;  %vm144_vm12 = vcmask 1046529  }
 0x133   :  { %1769 = vmatpush.bf16.msk.msrb.mxu0 %vm3801_vm10, %v3696_v43  ;;  %vm116_vm10 = vcmask 1043459  }
 0x134   :  { %v117_v31 = vsel %vm116_vm10, %v97_v55, %v98_v18  ;;  %v138_v51 = vsel %vm116_vm10, %v89_v49, %v96_v17  ;;  %v173_v29 = vsel %vm116_vm10, %v99_v28, %v100_v38 }
 0x137   :  { %1771 = vmatpush.bf16.msk.msrb.mxu0 %vm3804_vm6, %v3696_v43  ;;  %vm114_vm6 = vcmask 1041409  }
 0x138   :  { %v115_v0 = vsel %vm114_vm6, %v89_v49, %v96_v17  ;;  %v171_v27 = vsel %vm114_vm6, %v97_v55, %v98_v18 }
 0x13b   :  { %1773 = vmatpush.bf16.msk.msrb.mxu0 %vm2959_vm5, %v3696_v43  ;;  %v983_v54 = vpop.f32.mrf.mxu0  ;;  %vm3619_vm5 = vcmask 1044484  }
 0x13c   :  { %v128_v44 = vsel %vm3619_vm5, %v97_v55, %v98_v18 }
 0x13e   :  { %1190 = vmatmul.bf16.vlgmr.msrb.gmra.mxu0 %v3064_v23  ;;  %v996_v56 = vpop.f32.mrf.mxu1 }
 0x143   :  { %v985_v61 = vpop.f32.mrf.mxu0  ;;  %v1074_v10 = vpop.f32.mrf.mxu3 }
 0x144   :  { %v3265_v32 = vadd.f32 %v1074_v10, %v983_v54  ;;  %v139_v54 = vsel %vm120_vm9, %v97_v55, %v98_v18  ;;  %v149_v61 = vsel %vm3619_vm5, %v89_v49, %v96_v17  ;;  %v150_v10 = vsel %vm131_vm15, %v97_v55, %v98_v18 }
 0x146   :  { %v998_v33 = vpop.f32.mrf.mxu1 }
 0x147   :  { %v3267_v52 = vpop.f32.mrf.mxu2 }
 0x14b   :  { %v1076_v53 = vpop.f32.mrf.mxu3 }
 0x14f   :  { %v1011_v62 = vpop.f32.mrf.mxu2 }
 0x150   :  { %v119_v62 = vsel %vm3620_vm7, %v115_v0, %v117_v31  ;;  %vm3624_vm7 = vcmask 1045506   ;;  %v72_v0 = vld [vmem:[#allocation5 + $0x7] sm:$0xff]  ;;  %v174_v31 = vsel %vm3626_vm13, %v173_v29, %v101_v14 }
 0x15b   :  { %v1035_v1 = vpop.f32.mrf.mxu0 }
 0x15c   :  { %v1036_v63 = vadd.f32 %v1035_v1, %v944_v24  ;;  %v105_v24 = vsel %vm104_vm8, %v97_v55, %v98_v18  ;;  %v123_v1 = vsel %vm3623_vm14, %v121_v34, %v101_v14 }
 0x15d   :  { %v107_v33 = vsel %vm3625_vm11, %v103_v3, %v105_v24 }
 0x15e   :  { %v1048_v42 = vpop.f32.mrf.mxu1 }
 0x15f   :  { %v3271_v19 = vadd.f32 %v1048_v42, %v957_v26  ;;  %v109_v26 = vsel %vm3619_vm5, %v99_v28, %v100_v38 }
 0x160   :  { %v111_v53 = vsel %vm3621_vm2, %v109_v26, %v101_v14  ;;  %v172_v26 = vsel %vm144_vm12, %v171_v27, %v170_v25 }
 0x163   :  { %v1037_v7 = vpop.f32.mrf.mxu0  ;;  %v1126_v12 = vpop.f32.mrf.mxu3 }
 0x164   :  { %v1196_v2 = vadd.f32 %v1126_v12, %v1036_v63  ;;  %v130_v63 = vsel %vm3627_vm1, %v127_v41, %v128_v44  ;;  %v141_v7 = vsel %vm3626_vm13, %v138_v51, %v139_v54  ;;  %v69_v41 = vld [vmem:[#allocation2 + $0x2a] sm:$0xff]  ;;  %v76_v51 = vld [vmem:[#allocation5 + $0x23] sm:$0xff] }
 0x165   :  { %v74_v44 = vld [vmem:[#allocation5 + $0x15] sm:$0xff]  ;;  %v77_v54 = vld [vmem:[#allocation5 + $0x2a] sm:$0xff] }
 0x166   :  { %v1050_v15 = vpop.f32.mrf.mxu1  ;;  %v1209_v37 = vrot.slane %v1196_v2, 7  ;;  %v156_v2 = vsel %vm120_vm9, %v89_v49, %v96_v17 }
 0x167   :  { %v1061_v43 = vpop.f32.mrf.mxu2  ;;  %v151_v15 = vsel %vm3621_vm2, %v149_v61, %v150_v10  ;;  %vm112_vm2 = vcmask 1043456  }
 0x168   :  { %v3276_v40 = vadd.f32 %v1061_v43, %v3217_v21  ;;  %v152_v43 = vsel %vm3622_vm3, %v99_v28, %v100_v38  ;;  %v113_v61 = vsel %vm112_vm2, %v107_v33, %v111_v53 }
 0x169   :  { %v153_v20 = vsel %vm3625_vm11, %v152_v43, %v101_v14 }
 0x16b   :  { %v1128_v5 = vpop.f32.mrf.mxu3 }
 0x16c   :  { %v157_v5 = vsel %vm142_vm4, %v98_v18, %v97_v55 }
 0x16f   :  { %v1063_v6 = vpop.f32.mrf.mxu2 }
 0x170   :  { %v159_v6 = vsel %vm114_vm6, %v99_v28, %v100_v38 }
 0x17b   :  { %v1087_v8 = vpop.f32.mrf.mxu0 }
 0x17c   :  { %v3302_v23 = vadd.f32 %v1087_v8, %v996_v56  ;;  %v143_v56 = vsel %vm142_vm4, %v100_v38, %v99_v28  ;;  %v163_v8 = vsel %vm131_vm15, %v89_v49, %v96_v17 }
 0x17d   :  { %v145_v12 = vsel %vm144_vm12, %v101_v14, %v143_v56  ;;  %v165_v55 = vsel %vm133_vm0, %v164_v13, %v163_v8  ;;  %v85_v13 = vsub.f32 %v69_v41, %v77_v54 }
 0x17e   :  { %v3269_v9 = vpop.f32.mrf.mxu1 }
 0x182   :  { %v3273_v35 = vpop.f32.mrf.mxu3 }
 0x183   :  { %v1089_v16 = vpop.f32.mrf.mxu0  ;;  %v1200_v34 = vadd.f32 %v3273_v35, %v3302_v23 }
 0x184   :  { %v166_v16 = vsel %vm104_vm8, %v99_v28, %v100_v38 }
 0x185   :  { %v167_v18 = vsel %vm3627_vm1, %v166_v16, %v101_v14 }
 0x186   :  { %v1102_v39 = vpop.f32.mrf.mxu1  ;;  %v168_v53 = vsel %vm3624_vm7, %v167_v18, %v165_v55 }
 0x187   :  { %v1113_v45 = vpop.f32.mrf.mxu2  ;;  %v3339_v39 = vld [vmem:[#allocation2 + $0x7] sm:$0xff] }
 0x188   :  { %v1195_v47 = vadd.f32 %v1113_v45, %v1023_v46  ;;  %v132_v46 = vsel %vm131_vm15, %v99_v28, %v100_v38  ;;  %v3341_v45 = vld [vmem:[#allocation2 + $0xe] sm:$0xff]  ;;  %v3354_v38 = vld [vmem:[#allocation2 + $0x1c] sm:$0xff] }
 0x189   :  { %v134_v42 = vsel %vm133_vm0, %v101_v14, %v132_v46  ;;  %v3352_v28 = vld [vmem:[#allocation2 + $0x15] sm:$0xff] }
 0x18a   :  { %v3279_v48 = vsel %vm3622_vm3, %v1195_v47, %v1209_v37  ;;  %v3282_v57 = vsel %vm114_vm6, %v1195_v47, %v1209_v37  ;;  %v3285_v58 = vsel %vm104_vm8, %v1195_v47, %v1209_v37  ;;  %v3288_v59 = vsel %vm116_vm10, %v1195_v47, %v1209_v37  ;;  %v1180_v21 = vpop.f32.mrf.mxu3  ;;  %v75_v46 = vld [vmem:[#allocation5 + $0x1c] sm:$0xff] }
 0x18b   :  { %v3291_v60 = vsel %vm3619_vm5, %v1195_v47, %v1209_v37  ;;  %v3294_v4 = vsel %vm120_vm9, %v1195_v47, %v1209_v37  ;;  %v3297_v11 = vsel %vm131_vm15, %v1195_v47, %v1209_v37  ;;  %v3300_v22 = vsel %vm142_vm4, %v1209_v37, %v1195_v47  ;;  %v71_v47 = vld [vmem:[#allocation5] sm:$0xff]  ;;  %v73_v21 = vld [vmem:[#allocation5 + $0xe] sm:$0xff] }
 0x18c   :  { %vm124_vm5 = vcmask 1044481   ;;  %v158_v37 = vsel %vm3623_vm14, %v156_v2, %v157_v5  ;;  %v3347_v3 = vsel %vm3624_vm7, %v130_v63, %v134_v42  ;;  %vm3828_vm3 = vcmask 1042433   ;;  %v78_v63 = vld [vmem:[#allocation5 + $0x31] sm:$0xff] }
 0x18d   :  { %v3344_v50 = vsel %vm124_vm5, %v119_v62, %v123_v1  ;;  %v160_v17 = vsel %vm3828_vm3, %v159_v6, %v101_v14  ;;  %vm146_vm14 = vcmask 1046531   ;;  %v79_v56 = vsub.f32 %v63_v30, %v71_v47  ;;  %v70_v1 = vld [vmem:[#allocation2 + $0x31] sm:$0xff] }
 0x18e   :  { %v126_v10 = vrot.slane %v3344_v50, 1  ;;  %v80_v14 = vsub.f32 %v3339_v39, %v72_v0  ;;  %v81_v35 = vsub.f32 %v3341_v45, %v73_v21  ;;  %v147_v23 = vsel %vm146_vm14, %v141_v7, %v145_v12 }
 0x18f   :  { %v1115_v36 = vpop.f32.mrf.mxu2  ;;  %v154_v42 = vsel %vm112_vm2, %v153_v20, %v151_v15  ;;  %v161_v33 = vsel %vm124_vm5, %v160_v17, %v158_v37  ;;  %v82_v5 = vsub.f32 %v3352_v28, %v74_v44  ;;  %v83_v6 = vsub.f32 %v3354_v38, %v75_v46 }
 0x190   :  { %v68_v36 = vld [vmem:[#allocation2 + $0x23] sm:$0xff]  ;;  %v86_v25 = vsub.f32 %v70_v1, %v78_v63  ;;  %v148_v27 = vrot.slane %v147_v23, 3  ;;  %v155_v29 = vrot.slane %v154_v42, 4  ;;  %v162_v7 = vrot.slane %v161_v33, 5 }
 0x191   :  { %v84_v8 = vsub.f32 %v68_v36, %v76_v51  ;;  %v169_v12 = vrot.slane %v168_v53, 6  ;;  %v175_v15 = vsel %vm146_vm14, %v174_v31, %v172_v26  ;;  %v185_v20 = vmul.f32 %v113_v61, %v79_v56 }
 0x192   :  { %vm3829_vm3 = vcmask 1044484   ;;  %vm3830_vm7 = vcmask 1042433   ;;  %v176_v21 = vrot.slane %v175_v15, 7  ;;  %v188_v31 = vmul.f32 %v148_v27, %v82_v5 }
 0x193   :  { %v1213_v36 = vrot.slane %v1200_v34, 3  ;;  %v189_v41 = vmul.f32 %v155_v29, %v83_v6  ;;  %v190_v44 = vmul.f32 %v162_v7, %v84_v8  ;;  %v191_v46 = vmul.f32 %v169_v12, %v85_v13 }
 0x194   :  { %v193_v51 = vand.u32 2147483647, %v185_v20  ;;  %v196_v61 = vand.u32 2147483647, %v188_v31  ;;  %v1101_v13 = vadd.f32 %v3269_v9, %v3267_v52 }
 0x195   :  { %v198_v23 = vand.u32 2147483647, %v190_v44  ;;  %v3431_v42 = vand.u32 2147483647, %v191_v46 }
 0x196   :  { %v204_v5 = vmul.f32 4.5, %v196_v61  ;;  %v1318_v15 = vadd.f32 -0.055555556, %v193_v51 }
 0x197   :  { %v206_v8 = vmul.f32 4.5, %v198_v23 }
 0x198   :  { %v212_v12 = vmul.f32 %v204_v5, %v196_v61 }
 0x19b   :  { %v1139_v49 = vpop.f32.mrf.mxu0 }
 0x19c   :  { %v1197_v24 = vadd.f32 %v1139_v49, %v3271_v19  ;;  %v137_v19 = vrot.slane %v3347_v3, 2 }
 0x19e   :  { %v1152_v62 = vpop.f32.mrf.mxu1  ;;  %v1210_v43 = vrot.slane %v1197_v24, 6  ;;  %v186_v24 = vmul.f32 %v126_v10, %v80_v14  ;;  %v187_v26 = vmul.f32 %v137_v19, %v81_v35  ;;  %v197_v14 = vand.u32 2147483647, %v189_v41 }
 0x19f   :  { %v1198_v2 = vadd.f32 %v1152_v62, %v3276_v40  ;;  %v3835_v41 = vlaneseq }
 0x1a0   :  { %v194_v54 = vand.u32 2147483647, %v186_v24  ;;  %v195_v56 = vand.u32 2147483647, %v187_v26  ;;  %v205_v6 = vmul.f32 4.5, %v197_v14 }
 0x1a1   :  { %v1211_v16 = vrot.slane %v1198_v2, 5  ;;  %v201_v2 = vmul.f32 4.5, %v193_v51 }
 0x1a2   :  { %v202_v33 = vmul.f32 4.5, %v194_v54  ;;  %v203_v53 = vmul.f32 4.5, %v195_v56  ;;  %v213_v20 = vmul.f32 %v205_v6, %v197_v14 }
 0x1a3   :  { %v1216_v40 = vsel %vm104_vm8, %v1210_v43, %v1211_v16  ;;  %v1222_v30 = vsel %vm116_vm10, %v1210_v43, %v1211_v16  ;;  %v1229_v37 = vsel %vm3829_vm3, %v1210_v43, %v1211_v16  ;;  %v1236_v39 = vsel %vm120_vm9, %v1210_v43, %v1211_v16  ;;  %v1141_v45 = vpop.f32.mrf.mxu0 }
 0x1a4   :  { %v3380_v47 = vsel %vm3625_vm11, %v3279_v48, %v1216_v40  ;;  %v3384_v50 = vsel %vm3830_vm7, %v3282_v57, %v1222_v30  ;;  %v3388_v3 = vsel %vm3627_vm1, %v3285_v58, %v1229_v37  ;;  %v3392_v49 = vsel %vm3626_vm13, %v3288_v59, %v1236_v39 }
 0x1a5   :  { %v1243_v17 = vsel %vm131_vm15, %v1210_v43, %v1211_v16  ;;  %v1250_v55 = vsel %vm142_vm4, %v1211_v16, %v1210_v43  ;;  %vm3831_vm3 = vcmask 1040384   ;;  %v1264_v48 = vsel %vm114_vm6, %v1210_v43, %v1211_v16 }
 0x1a6   :  { %v1257_v18 = vsel %vm3831_vm3, %v1210_v43, %v1211_v16  ;;  %vm3832_vm11 = vcmask 1045508   ;;  %vm3833_vm7 = vcmask 1046533   ;;  %v3412_v28 = vsel %vm144_vm12, %v1264_v48, %v3300_v22  ;;  %v1154_v38 = vpop.f32.mrf.mxu1 }
 0x1a7   :  { %v3400_v57 = vsel %vm3832_vm11, %v3291_v60, %v1243_v17  ;;  %v3404_v58 = vsel %vm3833_vm7, %v3294_v4, %v1250_v55  ;;  %v3408_v59 = vsel %vm133_vm0, %v1257_v18, %v3297_v11  ;;  %v1165_v0 = vpop.f32.mrf.mxu2  ;;  %v192_v11 = vmul.f32 %v176_v21, %v86_v25 }
 0x1a8   :  { %v1199_v60 = vadd.f32 %v1165_v0, %v3265_v32  ;;  %vm3834_vm11 = vcmask 1044484   ;;  %v207_v16 = vmul.f32 4.5, %v3431_v42  ;;  %v209_v27 = vmul.f32 %v201_v2, %v193_v51 }
 0x1a9   :  { %v3433_v43 = vand.u32 2147483647, %v192_v11  ;;  %v210_v29 = vmul.f32 %v202_v33, %v194_v54  ;;  %v211_v7 = vmul.f32 %v203_v53, %v195_v56  ;;  %v1319_v40 = vadd.f32 -0.055555556, %v194_v54 }
 0x1aa   :  { %v1212_v4 = vrot.slane %v1199_v60, 4  ;;  %v1320_v30 = vadd.f32 -0.055555556, %v195_v56  ;;  %v1321_v37 = vadd.f32 -0.055555556, %v196_v61  ;;  %v214_v39 = vmul.f32 %v206_v8, %v198_v23 }
 0x1ab   :  { %v208_v25 = vmul.f32 4.5, %v3433_v43  ;;  %v1322_v45 = vadd.f32 -0.055555556, %v197_v14  ;;  %v1323_v17 = vadd.f32 -0.055555556, %v198_v23  ;;  %v215_v52 = vmul.f32 %v207_v16, %v3431_v42 }
 0x1ac   :  { %v1218_v22 = vsel %vm3834_vm11, %v1212_v4, %v1213_v36  ;;  %v1224_v62 = vsel %vm120_vm9, %v1212_v4, %v1213_v36  ;;  %v1231_v10 = vsel %vm131_vm15, %v1212_v4, %v1213_v36  ;;  %v1238_v19 = vsel %vm142_vm4, %v1213_v36, %v1212_v4 }
 0x1ad   :  { %v3420_v32 = vsel %vm3831_vm3, %v1212_v4, %v1213_v36  ;;  %v3423_v34 = vsel %vm114_vm6, %v1212_v4, %v1213_v36  ;;  %v3426_v1 = vsel %vm104_vm8, %v1212_v4, %v1213_v36  ;;  %v3429_v63 = vsel %vm116_vm10, %v1212_v4, %v1213_v36 }
 0x1ae   :  { %v1324_v55 = vadd.f32 -0.055555556, %v3431_v42  ;;  %vm225_vm8 = vcmp.le.f32.partialorder %v193_v51, 0.11111111  ;;  %vm226_vm6 = vcmp.le.f32.partialorder %v194_v54, 0.11111111  ;;  %v216_v48 = vmul.f32 %v208_v25, %v3433_v43 }
 0x1af   :  { %v1167_v35 = vpop.f32.mrf.mxu2  ;;  %vm227_vm10 = vcmp.le.f32.partialorder %v195_v56, 0.11111111  ;;  %vm228_vm9 = vcmp.le.f32.partialorder %v196_v61, 0.11111111  ;;  %vm229_vm15 = vcmp.le.f32.partialorder %v197_v14, 0.11111111  ;;  %v233_v0 = vsel %vm225_vm8, %v209_v27, %v1318_v15 }
 0x1b0   :  { %vm230_vm4 = vcmp.le.f32.partialorder %v198_v23, 0.11111111  ;;  %v1325_v38 = vadd.f32 -0.055555556, %v3433_v43  ;;  %vm231_vm7 = vcmp.le.f32.partialorder %v3431_v42, 0.11111111  ;;  %v234_v21 = vsel %vm226_vm6, %v210_v29, %v1319_v40 }
 0x1b1   :  { %vm232_vm11 = vcmp.le.f32.partialorder %v3433_v43, 0.11111111  ;;  %v235_v24 = vsel %vm227_vm10, %v211_v7, %v1320_v30  ;;  %v236_v31 = vsel %vm228_vm9, %v212_v12, %v1321_v37  ;;  %v237_v60 = vsel %vm229_vm15, %v213_v20, %v1322_v45 }
 0x1b2   :  { %v238_v36 = vsel %vm230_vm4, %v214_v39, %v1323_v17  ;;  %vm3446_vm3 = vcmp.lt.s32.totalorder %v3835_v41, 896  ;;  %vm3838_vm13 = vcmask 1045508   ;;  %vm3839_vm1 = vcmask 1046533  }
 0x1b3   :  { %vm3840_vm8 = vcmask 1045506  }
 0x1b4   :  { %vm3845_vm6 = vmmov %vm3840_vm8 }
 0x1bb   :  { %v1191_v9 = vpop.f32.mrf.mxu0 }
 0x1bc   :  { %v1201_v18 = vadd.f32 %v1191_v9, %v1101_v13  ;;  %v240_v13 = vsel %vm232_vm11, %v216_v48, %v1325_v38 }
 0x1be   :  { %v1214_v26 = vrot.slane %v1201_v18, 2 }
 0x1c0   :  { %v1219_v44 = vsel %vm3838_vm13, %v1218_v22, %v1214_v26  ;;  %v1225_v46 = vsel %vm3839_vm1, %v1224_v62, %v1214_v26  ;;  %v1232_v51 = vsel %vm133_vm0, %v1214_v26, %v1231_v10  ;;  %v1239_v11 = vsel %vm144_vm12, %v1214_v26, %v1238_v19 }
 0x1c1   :  { %v1220_v54 = vsel %vm112_vm2, %v3380_v47, %v1219_v44  ;;  %v1226_v56 = vsel %vm124_vm5, %v3384_v50, %v1225_v46  ;;  %v1233_v61 = vsel %vm3840_vm8, %v3388_v3, %v1232_v51  ;;  %v1240_v14 = vsel %vm146_vm14, %v3392_v49, %v1239_v11 }
 0x1c2   :  { %v1227_v35 = vrot.slane %v1226_v56, 1  ;;  %v1234_v22 = vrot.slane %v1233_v61, 2  ;;  %v1241_v23 = vrot.slane %v1240_v14, 3  ;;  %vm3841_vm1 = vcmask 1041408  }
 0x1c3   :  { %v1246_v62 = vsel %vm3841_vm1, %v3420_v32, %v1214_v26  ;;  %vm3842_vm0 = vcmask 1042433   ;;  %vm3843_vm13 = vcmask 1043458   ;;  %vm3844_vm12 = vcmask 1044483   ;;  %v1193_v19 = vpop.f32.mrf.mxu0 }
 0x1c4   :  { %v1247_v10 = vsel %vm112_vm2, %v1246_v62, %v3400_v57  ;;  %v1253_v47 = vsel %vm3842_vm0, %v3423_v34, %v1214_v26  ;;  %v1260_v50 = vsel %vm3843_vm13, %v3426_v1, %v1214_v26  ;;  %v1267_v3 = vsel %vm3844_vm12, %v3429_v63, %v1214_v26 }
 0x1c5   :  { %v1248_v49 = vrot.slane %v1247_v10, 4  ;;  %v1254_v2 = vsel %vm124_vm5, %v1253_v47, %v3404_v58  ;;  %v1261_v32 = vsel %vm3845_vm6, %v1260_v50, %v3408_v59  ;;  %v1268_v57 = vsel %vm146_vm14, %v1267_v3, %v3412_v28 }
 0x1c6   :  { %v239_v34 = vsel %vm231_vm7, %v215_v52, %v1324_v55  ;;  %v1255_v33 = vrot.slane %v1254_v2, 5  ;;  %v1262_v53 = vrot.slane %v1261_v32, 6  ;;  %v1278_v1 = vmul.f32 %v1220_v54, %v233_v0 }
 0x1c7   :  { %v1269_v5 = vrot.slane %v1268_v57, 7  ;;  %v1279_v6 = vmul.f32 %v1227_v35, %v234_v21  ;;  %v1280_v63 = vmul.f32 %v1234_v22, %v235_v24  ;;  %v1281_v8 = vmul.f32 %v1241_v23, %v236_v31 }
 0x1c8   :  { %v1282_v58 = vmul.f32 %v1248_v49, %v237_v60  ;;  %1290 = vst.msk [vmem:[#allocation8] sm:$0x7f] %vm3446_vm3, %v1278_v1  ;;  %v1283_v59 = vmul.f32 %v1255_v33, %v238_v36  ;;  %v1284_v28 = vmul.f32 %v1262_v53, %v239_v34 }
 0x1c9   :  { %1291 = vst.msk [vmem:[#allocation8 + $0x7] sm:$0x7f] %vm3446_vm3, %v1279_v6  ;;  %v1285_v42 = vmul.f32 %v1269_v5, %v240_v13 }
 0x1ca   :  { %1292 = vst.msk [vmem:[#allocation8 + $0xe] sm:$0x7f] %vm3446_vm3, %v1280_v63 }
 0x1cb   :  { %1293 = vst.msk [vmem:[#allocation8 + $0x15] sm:$0x7f] %vm3446_vm3, %v1281_v8 }
 0x1cc   :  { %1294 = vst.msk [vmem:[#allocation8 + $0x1c] sm:$0x7f] %vm3446_vm3, %v1282_v58 }
 0x1cd   :  { %1295 = vst.msk [vmem:[#allocation8 + $0x23] sm:$0x7f] %vm3446_vm3, %v1283_v59 }
 0x1ce   :  { %1296 = vst.msk [vmem:[#allocation8 + $0x2a] sm:$0x7f] %vm3446_vm3, %v1284_v28 }
 0x1cf   :  { %1297 = vst.msk [vmem:[#allocation8 + $0x31] sm:$0x7f] %vm3446_vm3, %v1285_v42 }
 0x1d0   :  { %1301 = vsyncadd [#allocation4], 784  ;;  %s1304_s6 = sshll.u32 %s3508_s4, 4  ;;  %s1889_s7 = smov [#allocation8]   ;;  %s1305_s6 = int_to_ptr.hbm [resolvable:$true] %s1304_s6 }
 0x1d1   :  { %s1302_s8 = sshll.u32 %s1889_s7, 4  ;;  %s1303_s8 = int_to_ptr.vmem [resolvable:$true] %s1302_s8 }
 0x1d2   :  { %1310 = dma.vmem_to_hbm [thread:$0]  %s1303_s8, 112, %s1305_s6, [#allocation4], %s1884_s20, %s1884_s20, %s1885_s21  }
 0x1d3   :  { %1881 = dma.done.wait [#allocation4], 896  }
 0x1d4   :  { %1882 = vsyncadd [#allocation4], 4294966400 }
 0x1d5   :  { %1315 = vsyncpa [#allocation3], 1 }
 0x1d6   :  { %1316 = vsyncpa [#allocation6], 1 }
 0x1d7   :  { %1317 = vsyncpa [#allocation4], 1 }

</bundles_post_ra>
